<compile_context>
chip_gen: v7x
topology: tpu7x:2x2x1
jax: 0.10.0
libtpu: 0.0.40
codegen_flags: <defaults>
</compile_context>

<pallas_src>
import math

import jax
import jax.numpy as jnp
from jax.experimental import pallas as pl
from jax.experimental.pallas import tpu as pltpu

# ----------------------------- config ---------------------------------------
BATCH = 2
SEQ = 8
HIDDEN = 32
NUM_HEADS = 4
HEAD_DIM = HIDDEN // NUM_HEADS
INTERMEDIATE = 64
NUM_LAYERS = 2
LN_EPS = 1e-5


# ----------------------------- kernel ---------------------------------------
def encoder_kernel(hid_ref, pos_ref, mask_ref,
                   wqkv_ref,   # [1, 3*NH, H, HD]  per-head Wq|Wk|Wv columns
                   bqkv_ref,   # [1, 3*NH, 1, HD]  per-head bq|bk|bv
                   wo_ref,     # [1, NH, HD, H]    per-head rows of Wo
                   w1_ref,     # [1, H, I]
                   b1_ref,     # [1, 1, I]
                   w2_ref,     # [1, I, H]
                   vec_ref,    # [1, 6, 1, H]      bo, ln1_g, ln1_b, b2, ln2_g, ln2_b
                   out_ref,    # [B, S, H]
                   h_scratch):  # VMEM [B*S, H] running hidden, resident across layers
    layer = pl.program_id(0)
    num_layers = pl.num_programs(0)
    B, S, H = BATCH, SEQ, HIDDEN

    # Layer 0: bring the input hidden state into the resident VMEM scratch.
    @pl.when(layer == 0)
    def _():
        h_scratch[...] = hid_ref[...].reshape(B * S, H)

    x = h_scratch[...]                        # [B*S, H] running hidden state
    posf = pos_ref[...].reshape(B * S, H)     # [B*S, H]
    bias = (1.0 - mask_ref[...]) * (-1e9)     # [B, 1, S] additive key-pad bias

    qk_in = x + posf
    scale = 1.0 / math.sqrt(HEAD_DIM)

    # --- self attention ------------------------------------------------------
    # Per-head projections over the whole flattened batch; head selection is a
    # leading-dim index on wrapper-stacked weights (no lane slicing).
    q_heads, k_heads, v_heads = [], [], []
    for h in range(NUM_HEADS):
        q_heads.append(jnp.dot(qk_in, wqkv_ref[0, h],
                               preferred_element_type=jnp.float32)
                       + bqkv_ref[0, h])
        k_heads.append(jnp.dot(qk_in, wqkv_ref[0, NUM_HEADS + h],
                               preferred_element_type=jnp.float32)
                       + bqkv_ref[0, NUM_HEADS + h])
        v_heads.append(jnp.dot(x, wqkv_ref[0, 2 * NUM_HEADS + h],
                               preferred_element_type=jnp.float32)
                       + bqkv_ref[0, 2 * NUM_HEADS + h])

    bo = vec_ref[0, 0]                         # [1, H]
    attn_rows = []
    for b in range(B):                         # static loop, B = 2
        r0, r1 = b * S, (b + 1) * S            # sublane-aligned row slices
        bias_b = bias[b]                       # [1, S]
        acc = jnp.zeros((S, H), jnp.float32)
        for h in range(NUM_HEADS):             # static loop, NH = 4
            qh = q_heads[h][r0:r1, :]          # [S, HD]
            kh = k_heads[h][r0:r1, :]          # [S, HD]
            vh = v_heads[h][r0:r1, :]          # [S, HD]
            s = jnp.dot(qh, kh.T, preferred_element_type=jnp.float32) * scale + bias_b
            s = s - jnp.max(s, axis=-1, keepdims=True)
            p = jnp.exp(s)
            p = p * pl.reciprocal(jnp.sum(p, axis=-1, keepdims=True), approx=True)
            oh = jnp.dot(p, vh, preferred_element_type=jnp.float32)        # [S, HD]
            # fold the output projection per head: concat_h(o_h) @ Wo
            #   == sum_h o_h @ Wo[h*HD:(h+1)*HD, :]   (no lane-wise concat)
            acc = acc + jnp.dot(oh, wo_ref[0, h],
                                preferred_element_type=jnp.float32)        # [S, H]
        attn_rows.append(acc + bo)
    attn = jnp.concatenate(attn_rows, axis=0)   # [B*S, H] (major-axis concat)

    # --- residual + LayerNorm 1 ----------------------------------------------
    ln1_g, ln1_b = vec_ref[0, 1], vec_ref[0, 2]
    y = x + attn
    mu = jnp.mean(y, axis=-1, keepdims=True)
    var = jnp.mean((y - mu) ** 2, axis=-1, keepdims=True)
    y = (y - mu) * jax.lax.rsqrt(var + LN_EPS) * ln1_g + ln1_b

    # --- feed-forward ---------------------------------------------------------
    f = jnp.dot(y, w1_ref[0], preferred_element_type=jnp.float32) + b1_ref[0]
    f = jnp.maximum(f, 0.0)
    f = jnp.dot(f, w2_ref[0], preferred_element_type=jnp.float32) + vec_ref[0, 3]

    # --- residual + LayerNorm 2 ----------------------------------------------
    ln2_g, ln2_b = vec_ref[0, 4], vec_ref[0, 5]
    z = y + f
    mu2 = jnp.mean(z, axis=-1, keepdims=True)
    var2 = jnp.mean((z - mu2) ** 2, axis=-1, keepdims=True)
    z = (z - mu2) * jax.lax.rsqrt(var2 + LN_EPS) * ln2_g + ln2_b

    # keep the hidden state resident for the next layer; write HBM output once.
    h_scratch[...] = z

    @pl.when(layer == num_layers - 1)
    def _():
        out_ref[...] = z.reshape(B, S, H)


# ----------------------------- wrapper ---------------------------------------
def pack_layer_params(layer_params):
    """Stack per-layer params into a few contiguous arrays (leading layer axis),
    with attention weights pre-split per head so the kernel never lane-slices."""
    NH, HD, H = NUM_HEADS, HEAD_DIM, HIDDEN

    def heads_cols(w):   # [H, H] -> [NH, H, HD]   (output columns per head)
        return jnp.transpose(w.reshape(H, NH, HD), (1, 0, 2))

    def heads_bias(b):   # [1, H] -> [NH, 1, HD]
        return b.reshape(NH, HD)[:, None, :]

    wqkv, bqkv, wo_h, w1, b1, w2, vec6 = [], [], [], [], [], [], []
    for p in layer_params:
        wqkv.append(jnp.concatenate(
            [heads_cols(p["wq"]), heads_cols(p["wk"]), heads_cols(p["wv"])], axis=0))
        bqkv.append(jnp.concatenate(
            [heads_bias(p["bq"]), heads_bias(p["bk"]), heads_bias(p["bv"])], axis=0))
        wo_h.append(p["wo"].reshape(NH, HD, H))          # rows of Wo per head
        w1.append(p["w1"]); b1.append(p["b1"]); w2.append(p["w2"])
        vec6.append(jnp.stack(
            [p["bo"], p["ln1_g"], p["ln1_b"], p["b2"], p["ln2_g"], p["ln2_b"]], axis=0))
    return (jnp.stack(wqkv), jnp.stack(bqkv), jnp.stack(wo_h),
            jnp.stack(w1), jnp.stack(b1), jnp.stack(w2), jnp.stack(vec6))


def encoder_forward(hidden, pos, mask, packed):
    wqkv, bqkv, wo_h, w1, b1, w2, vec6 = packed
    B, S, H = hidden.shape
    L = wqkv.shape[0]
    I = w1.shape[-1]
    NH, HD = NUM_HEADS, HEAD_DIM

    in_specs = [
        pl.BlockSpec((B, S, H), lambda l: (0, 0, 0)),            # hidden (layer 0 only)
        pl.BlockSpec((B, S, H), lambda l: (0, 0, 0)),            # pos (resident)
        pl.BlockSpec((B, 1, S), lambda l: (0, 0, 0)),            # mask (resident)
        pl.BlockSpec((1, 3 * NH, H, HD), lambda l: (l, 0, 0, 0)),  # per-head Wq|Wk|Wv
        pl.BlockSpec((1, 3 * NH, 1, HD), lambda l: (l, 0, 0, 0)),  # per-head biases
        pl.BlockSpec((1, NH, HD, H), lambda l: (l, 0, 0, 0)),      # per-head Wo rows
        pl.BlockSpec((1, H, I), lambda l: (l, 0, 0)),              # W1
        pl.BlockSpec((1, 1, I), lambda l: (l, 0, 0)),              # b1
        pl.BlockSpec((1, I, H), lambda l: (l, 0, 0)),              # W2
        pl.BlockSpec((1, 6, 1, H), lambda l: (l, 0, 0, 0)),        # bo, LN1, b2, LN2
    ]

    fn = pl.pallas_call(
        encoder_kernel,
        out_shape=jax.ShapeDtypeStruct((B, S, H), jnp.float32),
        grid=(L,),                                   # layers: sequential axis
        in_specs=in_specs,
        out_specs=pl.BlockSpec((B, S, H), lambda l: (0, 0, 0)),
        scratch_shapes=[pltpu.VMEM((B * S, H), jnp.float32)],
        compiler_params=pltpu.CompilerParams(
            dimension_semantics=("arbitrary",)),
    )
    return fn(hidden, pos, mask, wqkv, bqkv, wo_h, w1, b1, w2, vec6)


# --------------------------- pure-JAX reference ------------------------------
def _layer_ref(x, pos, mask, p):
    qk_in = x + pos
    q = qk_in @ p["wq"] + p["bq"]
    k = qk_in @ p["wk"] + p["bk"]
    v = x @ p["wv"] + p["bv"]
    B, S, H = x.shape
    q = q.reshape(B, S, NUM_HEADS, HEAD_DIM).transpose(0, 2, 1, 3)
    k = k.reshape(B, S, NUM_HEADS, HEAD_DIM).transpose(0, 2, 1, 3)
    v = v.reshape(B, S, NUM_HEADS, HEAD_DIM).transpose(0, 2, 1, 3)
    bias = (1.0 - mask)[:, :, None, :] * (-1e9)
    s = jnp.einsum("bhqd,bhkd->bhqk", q, k) / math.sqrt(HEAD_DIM) + bias
    pattn = jax.nn.softmax(s, axis=-1)
    a = jnp.einsum("bhqk,bhkd->bhqd", pattn, v).transpose(0, 2, 1, 3).reshape(B, S, H)
    a = a @ p["wo"] + p["bo"]
    y = x + a
    y = (y - y.mean(-1, keepdims=True)) * jax.lax.rsqrt(y.var(-1, keepdims=True) + LN_EPS)
    y = y * p["ln1_g"] + p["ln1_b"]
    f = jnp.maximum(y @ p["w1"] + p["b1"], 0.0) @ p["w2"] + p["b2"]
    z = y + f
    z = (z - z.mean(-1, keepdims=True)) * jax.lax.rsqrt(z.var(-1, keepdims=True) + LN_EPS)
    return z * p["ln2_g"] + p["ln2_b"]


def encoder_ref(hidden, pos, mask, layer_params):
    out = hidden
    for p in layer_params:
        out = _layer_ref(out, pos, mask, p)
    return out


# ------------------------------ param init -----------------------------------
def init_layer_params(key):
    ks = jax.random.split(key, 6)
    std = 0.02

    def w(k, shape):
        return jax.random.normal(k, shape, jnp.float32) * std

    H, I = HIDDEN, INTERMEDIATE
    return {
        "wq": w(ks[0], (H, H)), "bq": jnp.zeros((1, H), jnp.float32),
        "wk": w(ks[1], (H, H)), "bk": jnp.zeros((1, H), jnp.float32),
        "wv": w(ks[2], (H, H)), "bv": jnp.zeros((1, H), jnp.float32),
        "wo": w(ks[3], (H, H)), "bo": jnp.zeros((1, H), jnp.float32),
        "ln1_g": jnp.ones((1, H), jnp.float32), "ln1_b": jnp.zeros((1, H), jnp.float32),
        "w1": w(ks[4], (H, I)), "b1": jnp.zeros((1, I), jnp.float32),
        "w2": w(ks[5], (I, H)), "b2": jnp.zeros((1, H), jnp.float32),
        "ln2_g": jnp.ones((1, H), jnp.float32), "ln2_b": jnp.zeros((1, H), jnp.float32),
    }


# --------------------------------- main --------------------------------------
if __name__ == "__main__":
    key = jax.random.PRNGKey(0)
    k_h, k_p, k_layers = jax.random.split(key, 3)

    hidden = jax.random.normal(k_h, (BATCH, SEQ, HIDDEN), jnp.float32)
    pos = jax.random.normal(k_p, (BATCH, SEQ, HIDDEN), jnp.float32)

    # key padding mask: batch 0 fully valid, batch 1 has last 2 keys masked.
    mask = jnp.ones((BATCH, 1, SEQ), jnp.float32)
    mask = mask.at[1, 0, SEQ - 2:].set(0.0)

    layer_keys = jax.random.split(k_layers, NUM_LAYERS)
    layer_params = [init_layer_params(k) for k in layer_keys]
    packed = pack_layer_params(layer_params)

    out = encoder_forward(hidden, pos, mask, packed)
    out = jax.block_until_ready(out)

    ref = encoder_ref(hidden, pos, mask, layer_params)
    assert out.shape == (BATCH, SEQ, HIDDEN)
    assert jnp.allclose(out, ref, atol=2e-3, rtol=2e-3), "mismatch vs JAX reference"

    print("KERNEL_OK")
</pallas_src>

<mosaic_0001>
module attributes {stable_mosaic.version = 11 : i64} {
  func.func @encoder_kernel(%arg0: i32, %arg1: memref<2x8x32xf32, #tpu.memory_space<vmem>>, %arg2: memref<2x8x32xf32, #tpu.memory_space<vmem>>, %arg3: memref<2x1x8xf32, #tpu.memory_space<vmem>>, %arg4: memref<1x12x32x8xf32, #tpu.memory_space<vmem>>, %arg5: memref<1x12x1x8xf32, #tpu.memory_space<vmem>>, %arg6: memref<1x4x8x32xf32, #tpu.memory_space<vmem>>, %arg7: memref<1x32x64xf32, #tpu.memory_space<vmem>>, %arg8: memref<1x1x64xf32, #tpu.memory_space<vmem>>, %arg9: memref<1x64x32xf32, #tpu.memory_space<vmem>>, %arg10: memref<1x6x1x32xf32, #tpu.memory_space<vmem>>, %arg11: memref<2x8x32xf32, #tpu.memory_space<vmem>>, %arg12: memref<16x32xf32, #tpu.memory_space<vmem>>) attributes {dimension_semantics = [#tpu.dimension_semantics<arbitrary>], iteration_bounds = array<i64: 2>, scalar_prefetch = 0 : i64, scratch_operands = 1 : i64, tpu.core_type = #tpu.core_type<tc>, window_params = [{pipeline_mode = #tpu.pipeline_mode<synchronous>, transform_indices = @transform_0, window_bounds = array<i64: 2, 8, 32>}, {pipeline_mode = #tpu.pipeline_mode<synchronous>, transform_indices = @transform_1, window_bounds = array<i64: 2, 8, 32>}, {pipeline_mode = #tpu.pipeline_mode<synchronous>, transform_indices = @transform_2, window_bounds = array<i64: 2, 1, 8>}, {transform_indices = @transform_3, window_bounds = array<i64: 1, 12, 32, 8>}, {transform_indices = @transform_4, window_bounds = array<i64: 1, 12, 1, 8>}, {transform_indices = @transform_5, window_bounds = array<i64: 1, 4, 8, 32>}, {transform_indices = @transform_6, window_bounds = array<i64: 1, 32, 64>}, {transform_indices = @transform_7, window_bounds = array<i64: 1, 1, 64>}, {transform_indices = @transform_8, window_bounds = array<i64: 1, 64, 32>}, {transform_indices = @transform_9, window_bounds = array<i64: 1, 6, 1, 32>}, {pipeline_mode = #tpu.pipeline_mode<synchronous>, transform_indices = @transform_10, window_bounds = array<i64: 2, 8, 32>}]} {
    %c0_i32 = arith.constant 0 : i32
    %0 = arith.cmpi eq, %arg0, %c0_i32 : i32
    %1 = arith.extui %0 : i1 to i32
    %c0_i32_0 = arith.constant 0 : i32
    %2 = arith.cmpi ne, %1, %c0_i32_0 : i32
    scf.if %2 {
      %c0_237 = arith.constant 0 : index
      %c0_238 = arith.constant 0 : index
      %c0_239 = arith.constant 0 : index
      %375 = vector.load %arg1[%c0_237, %c0_238, %c0_239] : memref<2x8x32xf32, #tpu.memory_space<vmem>>, vector<2x8x32xf32>
      %376 = vector.shape_cast %375 : vector<2x8x32xf32> to vector<16x32xf32>
      %c0_240 = arith.constant 0 : index
      %c0_241 = arith.constant 0 : index
      %377 = vector.load %arg12[%c0_240, %c0_241] : memref<16x32xf32, #tpu.memory_space<vmem>>, vector<16x32xf32>
      tpu.vector_store %arg12[%c0_240, %c0_241], %376 {strides = array<i32>} : memref<16x32xf32, #tpu.memory_space<vmem>>, vector<16x32xf32>,
    } else {
    }
    %c0 = arith.constant 0 : index
    %c0_1 = arith.constant 0 : index
    %3 = vector.load %arg12[%c0, %c0_1] : memref<16x32xf32, #tpu.memory_space<vmem>>, vector<16x32xf32>
    %c0_2 = arith.constant 0 : index
    %c0_3 = arith.constant 0 : index
    %c0_4 = arith.constant 0 : index
    %4 = vector.load %arg2[%c0_2, %c0_3, %c0_4] : memref<2x8x32xf32, #tpu.memory_space<vmem>>, vector<2x8x32xf32>
    %5 = vector.shape_cast %4 : vector<2x8x32xf32> to vector<16x32xf32>
    %c0_5 = arith.constant 0 : index
    %c0_6 = arith.constant 0 : index
    %c0_7 = arith.constant 0 : index
    %6 = vector.load %arg3[%c0_5, %c0_6, %c0_7] : memref<2x1x8xf32, #tpu.memory_space<vmem>>, vector<2x1x8xf32>
    %cst = arith.constant 1.000000e+00 : f32
    %7 = vector.broadcast %cst : f32 to vector<2x1x8xf32>
    %8 = arith.subf %7, %6 : vector<2x1x8xf32>
    %cst_8 = arith.constant -1.000000e+09 : f32
    %9 = vector.broadcast %cst_8 : f32 to vector<2x1x8xf32>
    %10 = arith.mulf %8, %9 : vector<2x1x8xf32>
    %11 = arith.addf %3, %5 : vector<16x32xf32>
    %c0_9 = arith.constant 0 : index
    %c0_10 = arith.constant 0 : index
    %c0_11 = arith.constant 0 : index
    %c0_12 = arith.constant 0 : index
    %12 = vector.load %arg4[%c0_9, %c0_10, %c0_11, %c0_12] : memref<1x12x32x8xf32, #tpu.memory_space<vmem>>, vector<1x1x32x8xf32>
    %13 = vector.shape_cast %12 : vector<1x1x32x8xf32> to vector<32x8xf32>
    %cst_13 = arith.constant dense<0.000000e+00> : vector<16x8xf32>
    %14 = tpu.matmul %11, %13, %cst_13 {dimension_numbers = #tpu.dot_dimension_numbers<[1], [0], [0], [1], [0, 0, 1, 1], [], []>} : vector<16x32xf32>, vector<32x8xf32>, vector<16x8xf32> -> vector<16x8xf32>
    %c0_14 = arith.constant 0 : index
    %c0_15 = arith.constant 0 : index
    %c0_16 = arith.constant 0 : index
    %c0_17 = arith.constant 0 : index
    %15 = vector.load %arg5[%c0_14, %c0_15, %c0_16, %c0_17] : memref<1x12x1x8xf32, #tpu.memory_space<vmem>>, vector<1x1x1x8xf32>
    %16 = vector.shape_cast %15 : vector<1x1x1x8xf32> to vector<1x8xf32>
    %17 = vector.broadcast %16 : vector<1x8xf32> to vector<16x8xf32>
    %18 = arith.addf %14, %17 : vector<16x8xf32>
    %c0_18 = arith.constant 0 : index
    %c4 = arith.constant 4 : index
    %c0_19 = arith.constant 0 : index
    %c0_20 = arith.constant 0 : index
    %19 = vector.load %arg4[%c0_18, %c4, %c0_19, %c0_20] : memref<1x12x32x8xf32, #tpu.memory_space<vmem>>, vector<1x1x32x8xf32>
    %20 = vector.shape_cast %19 : vector<1x1x32x8xf32> to vector<32x8xf32>
    %cst_21 = arith.constant dense<0.000000e+00> : vector<16x8xf32>
    %21 = tpu.matmul %11, %20, %cst_21 {dimension_numbers = #tpu.dot_dimension_numbers<[1], [0], [0], [1], [0, 0, 1, 1], [], []>} : vector<16x32xf32>, vector<32x8xf32>, vector<16x8xf32> -> vector<16x8xf32>
    %c0_22 = arith.constant 0 : index
    %c4_23 = arith.constant 4 : index
    %c0_24 = arith.constant 0 : index
    %c0_25 = arith.constant 0 : index
    %22 = vector.load %arg5[%c0_22, %c4_23, %c0_24, %c0_25] : memref<1x12x1x8xf32, #tpu.memory_space<vmem>>, vector<1x1x1x8xf32>
    %23 = vector.shape_cast %22 : vector<1x1x1x8xf32> to vector<1x8xf32>
    %24 = vector.broadcast %23 : vector<1x8xf32> to vector<16x8xf32>
    %25 = arith.addf %21, %24 : vector<16x8xf32>
    %c0_26 = arith.constant 0 : index
    %c8 = arith.constant 8 : index
    %c0_27 = arith.constant 0 : index
    %c0_28 = arith.constant 0 : index
    %26 = vector.load %arg4[%c0_26, %c8, %c0_27, %c0_28] : memref<1x12x32x8xf32, #tpu.memory_space<vmem>>, vector<1x1x32x8xf32>
    %27 = vector.shape_cast %26 : vector<1x1x32x8xf32> to vector<32x8xf32>
    %cst_29 = arith.constant dense<0.000000e+00> : vector<16x8xf32>
    %28 = tpu.matmul %3, %27, %cst_29 {dimension_numbers = #tpu.dot_dimension_numbers<[1], [0], [0], [1], [0, 0, 1, 1], [], []>} : vector<16x32xf32>, vector<32x8xf32>, vector<16x8xf32> -> vector<16x8xf32>
    %c0_30 = arith.constant 0 : index
    %c8_31 = arith.constant 8 : index
    %c0_32 = arith.constant 0 : index
    %c0_33 = arith.constant 0 : index
    %29 = vector.load %arg5[%c0_30, %c8_31, %c0_32, %c0_33] : memref<1x12x1x8xf32, #tpu.memory_space<vmem>>, vector<1x1x1x8xf32>
    %30 = vector.shape_cast %29 : vector<1x1x1x8xf32> to vector<1x8xf32>
    %31 = vector.broadcast %30 : vector<1x8xf32> to vector<16x8xf32>
    %32 = arith.addf %28, %31 : vector<16x8xf32>
    %c0_34 = arith.constant 0 : index
    %c1 = arith.constant 1 : index
    %c0_35 = arith.constant 0 : index
    %c0_36 = arith.constant 0 : index
    %33 = vector.load %arg4[%c0_34, %c1, %c0_35, %c0_36] : memref<1x12x32x8xf32, #tpu.memory_space<vmem>>, vector<1x1x32x8xf32>
    %34 = vector.shape_cast %33 : vector<1x1x32x8xf32> to vector<32x8xf32>
    %cst_37 = arith.constant dense<0.000000e+00> : vector<16x8xf32>
    %35 = tpu.matmul %11, %34, %cst_37 {dimension_numbers = #tpu.dot_dimension_numbers<[1], [0], [0], [1], [0, 0, 1, 1], [], []>} : vector<16x32xf32>, vector<32x8xf32>, vector<16x8xf32> -> vector<16x8xf32>
    %c0_38 = arith.constant 0 : index
    %c1_39 = arith.constant 1 : index
    %c0_40 = arith.constant 0 : index
    %c0_41 = arith.constant 0 : index
    %36 = vector.load %arg5[%c0_38, %c1_39, %c0_40, %c0_41] : memref<1x12x1x8xf32, #tpu.memory_space<vmem>>, vector<1x1x1x8xf32>
    %37 = vector.shape_cast %36 : vector<1x1x1x8xf32> to vector<1x8xf32>
    %38 = vector.broadcast %37 : vector<1x8xf32> to vector<16x8xf32>
    %39 = arith.addf %35, %38 : vector<16x8xf32>
    %c0_42 = arith.constant 0 : index
    %c5 = arith.constant 5 : index
    %c0_43 = arith.constant 0 : index
    %c0_44 = arith.constant 0 : index
    %40 = vector.load %arg4[%c0_42, %c5, %c0_43, %c0_44] : memref<1x12x32x8xf32, #tpu.memory_space<vmem>>, vector<1x1x32x8xf32>
    %41 = vector.shape_cast %40 : vector<1x1x32x8xf32> to vector<32x8xf32>
    %cst_45 = arith.constant dense<0.000000e+00> : vector<16x8xf32>
    %42 = tpu.matmul %11, %41, %cst_45 {dimension_numbers = #tpu.dot_dimension_numbers<[1], [0], [0], [1], [0, 0, 1, 1], [], []>} : vector<16x32xf32>, vector<32x8xf32>, vector<16x8xf32> -> vector<16x8xf32>
    %c0_46 = arith.constant 0 : index
    %c5_47 = arith.constant 5 : index
    %c0_48 = arith.constant 0 : index
    %c0_49 = arith.constant 0 : index
    %43 = vector.load %arg5[%c0_46, %c5_47, %c0_48, %c0_49] : memref<1x12x1x8xf32, #tpu.memory_space<vmem>>, vector<1x1x1x8xf32>
    %44 = vector.shape_cast %43 : vector<1x1x1x8xf32> to vector<1x8xf32>
    %45 = vector.broadcast %44 : vector<1x8xf32> to vector<16x8xf32>
    %46 = arith.addf %42, %45 : vector<16x8xf32>
    %c0_50 = arith.constant 0 : index
    %c9 = arith.constant 9 : index
    %c0_51 = arith.constant 0 : index
    %c0_52 = arith.constant 0 : index
    %47 = vector.load %arg4[%c0_50, %c9, %c0_51, %c0_52] : memref<1x12x32x8xf32, #tpu.memory_space<vmem>>, vector<1x1x32x8xf32>
    %48 = vector.shape_cast %47 : vector<1x1x32x8xf32> to vector<32x8xf32>
    %cst_53 = arith.constant dense<0.000000e+00> : vector<16x8xf32>
    %49 = tpu.matmul %3, %48, %cst_53 {dimension_numbers = #tpu.dot_dimension_numbers<[1], [0], [0], [1], [0, 0, 1, 1], [], []>} : vector<16x32xf32>, vector<32x8xf32>, vector<16x8xf32> -> vector<16x8xf32>
    %c0_54 = arith.constant 0 : index
    %c9_55 = arith.constant 9 : index
    %c0_56 = arith.constant 0 : index
    %c0_57 = arith.constant 0 : index
    %50 = vector.load %arg5[%c0_54, %c9_55, %c0_56, %c0_57] : memref<1x12x1x8xf32, #tpu.memory_space<vmem>>, vector<1x1x1x8xf32>
    %51 = vector.shape_cast %50 : vector<1x1x1x8xf32> to vector<1x8xf32>
    %52 = vector.broadcast %51 : vector<1x8xf32> to vector<16x8xf32>
    %53 = arith.addf %49, %52 : vector<16x8xf32>
    %c0_58 = arith.constant 0 : index
    %c2 = arith.constant 2 : index
    %c0_59 = arith.constant 0 : index
    %c0_60 = arith.constant 0 : index
    %54 = vector.load %arg4[%c0_58, %c2, %c0_59, %c0_60] : memref<1x12x32x8xf32, #tpu.memory_space<vmem>>, vector<1x1x32x8xf32>
    %55 = vector.shape_cast %54 : vector<1x1x32x8xf32> to vector<32x8xf32>
    %cst_61 = arith.constant dense<0.000000e+00> : vector<16x8xf32>
    %56 = tpu.matmul %11, %55, %cst_61 {dimension_numbers = #tpu.dot_dimension_numbers<[1], [0], [0], [1], [0, 0, 1, 1], [], []>} : vector<16x32xf32>, vector<32x8xf32>, vector<16x8xf32> -> vector<16x8xf32>
    %c0_62 = arith.constant 0 : index
    %c2_63 = arith.constant 2 : index
    %c0_64 = arith.constant 0 : index
    %c0_65 = arith.constant 0 : index
    %57 = vector.load %arg5[%c0_62, %c2_63, %c0_64, %c0_65] : memref<1x12x1x8xf32, #tpu.memory_space<vmem>>, vector<1x1x1x8xf32>
    %58 = vector.shape_cast %57 : vector<1x1x1x8xf32> to vector<1x8xf32>
    %59 = vector.broadcast %58 : vector<1x8xf32> to vector<16x8xf32>
    %60 = arith.addf %56, %59 : vector<16x8xf32>
    %c0_66 = arith.constant 0 : index
    %c6 = arith.constant 6 : index
    %c0_67 = arith.constant 0 : index
    %c0_68 = arith.constant 0 : index
    %61 = vector.load %arg4[%c0_66, %c6, %c0_67, %c0_68] : memref<1x12x32x8xf32, #tpu.memory_space<vmem>>, vector<1x1x32x8xf32>
    %62 = vector.shape_cast %61 : vector<1x1x32x8xf32> to vector<32x8xf32>
    %cst_69 = arith.constant dense<0.000000e+00> : vector<16x8xf32>
    %63 = tpu.matmul %11, %62, %cst_69 {dimension_numbers = #tpu.dot_dimension_numbers<[1], [0], [0], [1], [0, 0, 1, 1], [], []>} : vector<16x32xf32>, vector<32x8xf32>, vector<16x8xf32> -> vector<16x8xf32>
    %c0_70 = arith.constant 0 : index
    %c6_71 = arith.constant 6 : index
    %c0_72 = arith.constant 0 : index
    %c0_73 = arith.constant 0 : index
    %64 = vector.load %arg5[%c0_70, %c6_71, %c0_72, %c0_73] : memref<1x12x1x8xf32, #tpu.memory_space<vmem>>, vector<1x1x1x8xf32>
    %65 = vector.shape_cast %64 : vector<1x1x1x8xf32> to vector<1x8xf32>
    %66 = vector.broadcast %65 : vector<1x8xf32> to vector<16x8xf32>
    %67 = arith.addf %63, %66 : vector<16x8xf32>
    %c0_74 = arith.constant 0 : index
    %c10 = arith.constant 10 : index
    %c0_75 = arith.constant 0 : index
    %c0_76 = arith.constant 0 : index
    %68 = vector.load %arg4[%c0_74, %c10, %c0_75, %c0_76] : memref<1x12x32x8xf32, #tpu.memory_space<vmem>>, vector<1x1x32x8xf32>
    %69 = vector.shape_cast %68 : vector<1x1x32x8xf32> to vector<32x8xf32>
    %cst_77 = arith.constant dense<0.000000e+00> : vector<16x8xf32>
    %70 = tpu.matmul %3, %69, %cst_77 {dimension_numbers = #tpu.dot_dimension_numbers<[1], [0], [0], [1], [0, 0, 1, 1], [], []>} : vector<16x32xf32>, vector<32x8xf32>, vector<16x8xf32> -> vector<16x8xf32>
    %c0_78 = arith.constant 0 : index
    %c10_79 = arith.constant 10 : index
    %c0_80 = arith.constant 0 : index
    %c0_81 = arith.constant 0 : index
    %71 = vector.load %arg5[%c0_78, %c10_79, %c0_80, %c0_81] : memref<1x12x1x8xf32, #tpu.memory_space<vmem>>, vector<1x1x1x8xf32>
    %72 = vector.shape_cast %71 : vector<1x1x1x8xf32> to vector<1x8xf32>
    %73 = vector.broadcast %72 : vector<1x8xf32> to vector<16x8xf32>
    %74 = arith.addf %70, %73 : vector<16x8xf32>
    %c0_82 = arith.constant 0 : index
    %c3 = arith.constant 3 : index
    %c0_83 = arith.constant 0 : index
    %c0_84 = arith.constant 0 : index
    %75 = vector.load %arg4[%c0_82, %c3, %c0_83, %c0_84] : memref<1x12x32x8xf32, #tpu.memory_space<vmem>>, vector<1x1x32x8xf32>
    %76 = vector.shape_cast %75 : vector<1x1x32x8xf32> to vector<32x8xf32>
    %cst_85 = arith.constant dense<0.000000e+00> : vector<16x8xf32>
    %77 = tpu.matmul %11, %76, %cst_85 {dimension_numbers = #tpu.dot_dimension_numbers<[1], [0], [0], [1], [0, 0, 1, 1], [], []>} : vector<16x32xf32>, vector<32x8xf32>, vector<16x8xf32> -> vector<16x8xf32>
    %c0_86 = arith.constant 0 : index
    %c3_87 = arith.constant 3 : index
    %c0_88 = arith.constant 0 : index
    %c0_89 = arith.constant 0 : index
    %78 = vector.load %arg5[%c0_86, %c3_87, %c0_88, %c0_89] : memref<1x12x1x8xf32, #tpu.memory_space<vmem>>, vector<1x1x1x8xf32>
    %79 = vector.shape_cast %78 : vector<1x1x1x8xf32> to vector<1x8xf32>
    %80 = vector.broadcast %79 : vector<1x8xf32> to vector<16x8xf32>
    %81 = arith.addf %77, %80 : vector<16x8xf32>
    %c0_90 = arith.constant 0 : index
    %c7 = arith.constant 7 : index
    %c0_91 = arith.constant 0 : index
    %c0_92 = arith.constant 0 : index
    %82 = vector.load %arg4[%c0_90, %c7, %c0_91, %c0_92] : memref<1x12x32x8xf32, #tpu.memory_space<vmem>>, vector<1x1x32x8xf32>
    %83 = vector.shape_cast %82 : vector<1x1x32x8xf32> to vector<32x8xf32>
    %cst_93 = arith.constant dense<0.000000e+00> : vector<16x8xf32>
    %84 = tpu.matmul %11, %83, %cst_93 {dimension_numbers = #tpu.dot_dimension_numbers<[1], [0], [0], [1], [0, 0, 1, 1], [], []>} : vector<16x32xf32>, vector<32x8xf32>, vector<16x8xf32> -> vector<16x8xf32>
    %c0_94 = arith.constant 0 : index
    %c7_95 = arith.constant 7 : index
    %c0_96 = arith.constant 0 : index
    %c0_97 = arith.constant 0 : index
    %85 = vector.load %arg5[%c0_94, %c7_95, %c0_96, %c0_97] : memref<1x12x1x8xf32, #tpu.memory_space<vmem>>, vector<1x1x1x8xf32>
    %86 = vector.shape_cast %85 : vector<1x1x1x8xf32> to vector<1x8xf32>
    %87 = vector.broadcast %86 : vector<1x8xf32> to vector<16x8xf32>
    %88 = arith.addf %84, %87 : vector<16x8xf32>
    %c0_98 = arith.constant 0 : index
    %c11 = arith.constant 11 : index
    %c0_99 = arith.constant 0 : index
    %c0_100 = arith.constant 0 : index
    %89 = vector.load %arg4[%c0_98, %c11, %c0_99, %c0_100] : memref<1x12x32x8xf32, #tpu.memory_space<vmem>>, vector<1x1x32x8xf32>
    %90 = vector.shape_cast %89 : vector<1x1x32x8xf32> to vector<32x8xf32>
    %cst_101 = arith.constant dense<0.000000e+00> : vector<16x8xf32>
    %91 = tpu.matmul %3, %90, %cst_101 {dimension_numbers = #tpu.dot_dimension_numbers<[1], [0], [0], [1], [0, 0, 1, 1], [], []>} : vector<16x32xf32>, vector<32x8xf32>, vector<16x8xf32> -> vector<16x8xf32>
    %c0_102 = arith.constant 0 : index
    %c11_103 = arith.constant 11 : index
    %c0_104 = arith.constant 0 : index
    %c0_105 = arith.constant 0 : index
    %92 = vector.load %arg5[%c0_102, %c11_103, %c0_104, %c0_105] : memref<1x12x1x8xf32, #tpu.memory_space<vmem>>, vector<1x1x1x8xf32>
    %93 = vector.shape_cast %92 : vector<1x1x1x8xf32> to vector<1x8xf32>
    %94 = vector.broadcast %93 : vector<1x8xf32> to vector<16x8xf32>
    %95 = arith.addf %91, %94 : vector<16x8xf32>
    %c0_106 = arith.constant 0 : index
    %c0_107 = arith.constant 0 : index
    %c0_108 = arith.constant 0 : index
    %c0_109 = arith.constant 0 : index
    %96 = vector.load %arg10[%c0_106, %c0_107, %c0_108, %c0_109] : memref<1x6x1x32xf32, #tpu.memory_space<vmem>>, vector<1x1x1x32xf32>
    %97 = vector.shape_cast %96 : vector<1x1x1x32xf32> to vector<1x32xf32>
    %98 = vector.extract_strided_slice %10 {offsets = [0, 0, 0], sizes = [1, 1, 8], strides = [1, 1, 1]} : vector<2x1x8xf32> to vector<1x1x8xf32>
    %99 = vector.shape_cast %98 : vector<1x1x8xf32> to vector<1x8xf32>
    %cst_110 = arith.constant 0.000000e+00 : f32
    %100 = vector.broadcast %cst_110 : f32 to vector<8x32xf32>
    %101 = vector.extract_strided_slice %18 {offsets = [0, 0], sizes = [8, 8], strides = [1, 1]} : vector<16x8xf32> to vector<8x8xf32>
    %102 = vector.extract_strided_slice %25 {offsets = [0, 0], sizes = [8, 8], strides = [1, 1]} : vector<16x8xf32> to vector<8x8xf32>
    %103 = vector.extract_strided_slice %32 {offsets = [0, 0], sizes = [8, 8], strides = [1, 1]} : vector<16x8xf32> to vector<8x8xf32>
    %104 = tpu.transpose %102, [1, 0] : vector<8x8xf32> -> vector<8x8xf32>
    %cst_111 = arith.constant dense<0.000000e+00> : vector<8x8xf32>
    %105 = tpu.matmul %101, %104, %cst_111 {dimension_numbers = #tpu.dot_dimension_numbers<[1], [0], [0], [1], [0, 0, 1, 1], [], []>} : vector<8x8xf32>, vector<8x8xf32>, vector<8x8xf32> -> vector<8x8xf32>
    %cst_112 = arith.constant 0.353553385 : f32
    %106 = vector.broadcast %cst_112 : f32 to vector<8x8xf32>
    %107 = arith.mulf %105, %106 : vector<8x8xf32>
    %108 = vector.broadcast %99 : vector<1x8xf32> to vector<8x8xf32>
    %109 = arith.addf %107, %108 : vector<8x8xf32>
    %cst_113 = arith.constant dense<0xFF800000> : vector<8xf32>
    %110 = vector.multi_reduction <maximumf>, %109, %cst_113 [1] : vector<8x8xf32> to vector<8xf32>
    %111 = vector.shape_cast %110 : vector<8xf32> to vector<8x1xf32>
    %112 = vector.broadcast %111 : vector<8x1xf32> to vector<8x8xf32>
    %113 = arith.subf %109, %112 : vector<8x8xf32>
    %114 = math.exp %113 : vector<8x8xf32>
    %cst_114 = arith.constant dense<0.000000e+00> : vector<8xf32>
    %115 = vector.multi_reduction <add>, %114, %cst_114 [1] : vector<8x8xf32> to vector<8xf32>
    %116 = vector.shape_cast %115 : vector<8xf32> to vector<8x1xf32>
    %117 = tpu.reciprocal %116 {approx = true} : vector<8x1xf32> -> vector<8x1xf32>
    %118 = vector.broadcast %117 : vector<8x1xf32> to vector<8x8xf32>
    %119 = arith.mulf %114, %118 : vector<8x8xf32>
    %cst_115 = arith.constant dense<0.000000e+00> : vector<8x8xf32>
    %120 = tpu.matmul %119, %103, %cst_115 {dimension_numbers = #tpu.dot_dimension_numbers<[1], [0], [0], [1], [0, 0, 1, 1], [], []>} : vector<8x8xf32>, vector<8x8xf32>, vector<8x8xf32> -> vector<8x8xf32>
    %c0_116 = arith.constant 0 : index
    %c0_117 = arith.constant 0 : index
    %c0_118 = arith.constant 0 : index
    %c0_119 = arith.constant 0 : index
    %121 = vector.load %arg6[%c0_116, %c0_117, %c0_118, %c0_119] : memref<1x4x8x32xf32, #tpu.memory_space<vmem>>, vector<1x1x8x32xf32>
    %122 = vector.shape_cast %121 : vector<1x1x8x32xf32> to vector<8x32xf32>
    %cst_120 = arith.constant dense<0.000000e+00> : vector<8x32xf32>
    %123 = tpu.matmul %120, %122, %cst_120 {dimension_numbers = #tpu.dot_dimension_numbers<[1], [0], [0], [1], [0, 0, 1, 1], [], []>} : vector<8x8xf32>, vector<8x32xf32>, vector<8x32xf32> -> vector<8x32xf32>
    %124 = arith.addf %100, %123 : vector<8x32xf32>
    %125 = vector.extract_strided_slice %39 {offsets = [0, 0], sizes = [8, 8], strides = [1, 1]} : vector<16x8xf32> to vector<8x8xf32>
    %126 = vector.extract_strided_slice %46 {offsets = [0, 0], sizes = [8, 8], strides = [1, 1]} : vector<16x8xf32> to vector<8x8xf32>
    %127 = vector.extract_strided_slice %53 {offsets = [0, 0], sizes = [8, 8], strides = [1, 1]} : vector<16x8xf32> to vector<8x8xf32>
    %128 = tpu.transpose %126, [1, 0] : vector<8x8xf32> -> vector<8x8xf32>
    %cst_121 = arith.constant dense<0.000000e+00> : vector<8x8xf32>
    %129 = tpu.matmul %125, %128, %cst_121 {dimension_numbers = #tpu.dot_dimension_numbers<[1], [0], [0], [1], [0, 0, 1, 1], [], []>} : vector<8x8xf32>, vector<8x8xf32>, vector<8x8xf32> -> vector<8x8xf32>
    %cst_122 = arith.constant 0.353553385 : f32
    %130 = vector.broadcast %cst_122 : f32 to vector<8x8xf32>
    %131 = arith.mulf %129, %130 : vector<8x8xf32>
    %132 = vector.broadcast %99 : vector<1x8xf32> to vector<8x8xf32>
    %133 = arith.addf %131, %132 : vector<8x8xf32>
    %cst_123 = arith.constant dense<0xFF800000> : vector<8xf32>
    %134 = vector.multi_reduction <maximumf>, %133, %cst_123 [1] : vector<8x8xf32> to vector<8xf32>
    %135 = vector.shape_cast %134 : vector<8xf32> to vector<8x1xf32>
    %136 = vector.broadcast %135 : vector<8x1xf32> to vector<8x8xf32>
    %137 = arith.subf %133, %136 : vector<8x8xf32>
    %138 = math.exp %137 : vector<8x8xf32>
    %cst_124 = arith.constant dense<0.000000e+00> : vector<8xf32>
    %139 = vector.multi_reduction <add>, %138, %cst_124 [1] : vector<8x8xf32> to vector<8xf32>
    %140 = vector.shape_cast %139 : vector<8xf32> to vector<8x1xf32>
    %141 = tpu.reciprocal %140 {approx = true} : vector<8x1xf32> -> vector<8x1xf32>
    %142 = vector.broadcast %141 : vector<8x1xf32> to vector<8x8xf32>
    %143 = arith.mulf %138, %142 : vector<8x8xf32>
    %cst_125 = arith.constant dense<0.000000e+00> : vector<8x8xf32>
    %144 = tpu.matmul %143, %127, %cst_125 {dimension_numbers = #tpu.dot_dimension_numbers<[1], [0], [0], [1], [0, 0, 1, 1], [], []>} : vector<8x8xf32>, vector<8x8xf32>, vector<8x8xf32> -> vector<8x8xf32>
    %c0_126 = arith.constant 0 : index
    %c1_127 = arith.constant 1 : index
    %c0_128 = arith.constant 0 : index
    %c0_129 = arith.constant 0 : index
    %145 = vector.load %arg6[%c0_126, %c1_127, %c0_128, %c0_129] : memref<1x4x8x32xf32, #tpu.memory_space<vmem>>, vector<1x1x8x32xf32>
    %146 = vector.shape_cast %145 : vector<1x1x8x32xf32> to vector<8x32xf32>
    %cst_130 = arith.constant dense<0.000000e+00> : vector<8x32xf32>
    %147 = tpu.matmul %144, %146, %cst_130 {dimension_numbers = #tpu.dot_dimension_numbers<[1], [0], [0], [1], [0, 0, 1, 1], [], []>} : vector<8x8xf32>, vector<8x32xf32>, vector<8x32xf32> -> vector<8x32xf32>
    %148 = arith.addf %124, %147 : vector<8x32xf32>
    %149 = vector.extract_strided_slice %60 {offsets = [0, 0], sizes = [8, 8], strides = [1, 1]} : vector<16x8xf32> to vector<8x8xf32>
    %150 = vector.extract_strided_slice %67 {offsets = [0, 0], sizes = [8, 8], strides = [1, 1]} : vector<16x8xf32> to vector<8x8xf32>
    %151 = vector.extract_strided_slice %74 {offsets = [0, 0], sizes = [8, 8], strides = [1, 1]} : vector<16x8xf32> to vector<8x8xf32>
    %152 = tpu.transpose %150, [1, 0] : vector<8x8xf32> -> vector<8x8xf32>
    %cst_131 = arith.constant dense<0.000000e+00> : vector<8x8xf32>
    %153 = tpu.matmul %149, %152, %cst_131 {dimension_numbers = #tpu.dot_dimension_numbers<[1], [0], [0], [1], [0, 0, 1, 1], [], []>} : vector<8x8xf32>, vector<8x8xf32>, vector<8x8xf32> -> vector<8x8xf32>
    %cst_132 = arith.constant 0.353553385 : f32
    %154 = vector.broadcast %cst_132 : f32 to vector<8x8xf32>
    %155 = arith.mulf %153, %154 : vector<8x8xf32>
    %156 = vector.broadcast %99 : vector<1x8xf32> to vector<8x8xf32>
    %157 = arith.addf %155, %156 : vector<8x8xf32>
    %cst_133 = arith.constant dense<0xFF800000> : vector<8xf32>
    %158 = vector.multi_reduction <maximumf>, %157, %cst_133 [1] : vector<8x8xf32> to vector<8xf32>
    %159 = vector.shape_cast %158 : vector<8xf32> to vector<8x1xf32>
    %160 = vector.broadcast %159 : vector<8x1xf32> to vector<8x8xf32>
    %161 = arith.subf %157, %160 : vector<8x8xf32>
    %162 = math.exp %161 : vector<8x8xf32>
    %cst_134 = arith.constant dense<0.000000e+00> : vector<8xf32>
    %163 = vector.multi_reduction <add>, %162, %cst_134 [1] : vector<8x8xf32> to vector<8xf32>
    %164 = vector.shape_cast %163 : vector<8xf32> to vector<8x1xf32>
    %165 = tpu.reciprocal %164 {approx = true} : vector<8x1xf32> -> vector<8x1xf32>
    %166 = vector.broadcast %165 : vector<8x1xf32> to vector<8x8xf32>
    %167 = arith.mulf %162, %166 : vector<8x8xf32>
    %cst_135 = arith.constant dense<0.000000e+00> : vector<8x8xf32>
    %168 = tpu.matmul %167, %151, %cst_135 {dimension_numbers = #tpu.dot_dimension_numbers<[1], [0], [0], [1], [0, 0, 1, 1], [], []>} : vector<8x8xf32>, vector<8x8xf32>, vector<8x8xf32> -> vector<8x8xf32>
    %c0_136 = arith.constant 0 : index
    %c2_137 = arith.constant 2 : index
    %c0_138 = arith.constant 0 : index
    %c0_139 = arith.constant 0 : index
    %169 = vector.load %arg6[%c0_136, %c2_137, %c0_138, %c0_139] : memref<1x4x8x32xf32, #tpu.memory_space<vmem>>, vector<1x1x8x32xf32>
    %170 = vector.shape_cast %169 : vector<1x1x8x32xf32> to vector<8x32xf32>
    %cst_140 = arith.constant dense<0.000000e+00> : vector<8x32xf32>
    %171 = tpu.matmul %168, %170, %cst_140 {dimension_numbers = #tpu.dot_dimension_numbers<[1], [0], [0], [1], [0, 0, 1, 1], [], []>} : vector<8x8xf32>, vector<8x32xf32>, vector<8x32xf32> -> vector<8x32xf32>
    %172 = arith.addf %148, %171 : vector<8x32xf32>
    %173 = vector.extract_strided_slice %81 {offsets = [0, 0], sizes = [8, 8], strides = [1, 1]} : vector<16x8xf32> to vector<8x8xf32>
    %174 = vector.extract_strided_slice %88 {offsets = [0, 0], sizes = [8, 8], strides = [1, 1]} : vector<16x8xf32> to vector<8x8xf32>
    %175 = vector.extract_strided_slice %95 {offsets = [0, 0], sizes = [8, 8], strides = [1, 1]} : vector<16x8xf32> to vector<8x8xf32>
    %176 = tpu.transpose %174, [1, 0] : vector<8x8xf32> -> vector<8x8xf32>
    %cst_141 = arith.constant dense<0.000000e+00> : vector<8x8xf32>
    %177 = tpu.matmul %173, %176, %cst_141 {dimension_numbers = #tpu.dot_dimension_numbers<[1], [0], [0], [1], [0, 0, 1, 1], [], []>} : vector<8x8xf32>, vector<8x8xf32>, vector<8x8xf32> -> vector<8x8xf32>
    %cst_142 = arith.constant 0.353553385 : f32
    %178 = vector.broadcast %cst_142 : f32 to vector<8x8xf32>
    %179 = arith.mulf %177, %178 : vector<8x8xf32>
    %180 = vector.broadcast %99 : vector<1x8xf32> to vector<8x8xf32>
    %181 = arith.addf %179, %180 : vector<8x8xf32>
    %cst_143 = arith.constant dense<0xFF800000> : vector<8xf32>
    %182 = vector.multi_reduction <maximumf>, %181, %cst_143 [1] : vector<8x8xf32> to vector<8xf32>
    %183 = vector.shape_cast %182 : vector<8xf32> to vector<8x1xf32>
    %184 = vector.broadcast %183 : vector<8x1xf32> to vector<8x8xf32>
    %185 = arith.subf %181, %184 : vector<8x8xf32>
    %186 = math.exp %185 : vector<8x8xf32>
    %cst_144 = arith.constant dense<0.000000e+00> : vector<8xf32>
    %187 = vector.multi_reduction <add>, %186, %cst_144 [1] : vector<8x8xf32> to vector<8xf32>
    %188 = vector.shape_cast %187 : vector<8xf32> to vector<8x1xf32>
    %189 = tpu.reciprocal %188 {approx = true} : vector<8x1xf32> -> vector<8x1xf32>
    %190 = vector.broadcast %189 : vector<8x1xf32> to vector<8x8xf32>
    %191 = arith.mulf %186, %190 : vector<8x8xf32>
    %cst_145 = arith.constant dense<0.000000e+00> : vector<8x8xf32>
    %192 = tpu.matmul %191, %175, %cst_145 {dimension_numbers = #tpu.dot_dimension_numbers<[1], [0], [0], [1], [0, 0, 1, 1], [], []>} : vector<8x8xf32>, vector<8x8xf32>, vector<8x8xf32> -> vector<8x8xf32>
    %c0_146 = arith.constant 0 : index
    %c3_147 = arith.constant 3 : index
    %c0_148 = arith.constant 0 : index
    %c0_149 = arith.constant 0 : index
    %193 = vector.load %arg6[%c0_146, %c3_147, %c0_148, %c0_149] : memref<1x4x8x32xf32, #tpu.memory_space<vmem>>, vector<1x1x8x32xf32>
    %194 = vector.shape_cast %193 : vector<1x1x8x32xf32> to vector<8x32xf32>
    %cst_150 = arith.constant dense<0.000000e+00> : vector<8x32xf32>
    %195 = tpu.matmul %192, %194, %cst_150 {dimension_numbers = #tpu.dot_dimension_numbers<[1], [0], [0], [1], [0, 0, 1, 1], [], []>} : vector<8x8xf32>, vector<8x32xf32>, vector<8x32xf32> -> vector<8x32xf32>
    %196 = arith.addf %172, %195 : vector<8x32xf32>
    %197 = vector.broadcast %97 : vector<1x32xf32> to vector<8x32xf32>
    %198 = arith.addf %196, %197 : vector<8x32xf32>
    %199 = vector.extract_strided_slice %10 {offsets = [1, 0, 0], sizes = [1, 1, 8], strides = [1, 1, 1]} : vector<2x1x8xf32> to vector<1x1x8xf32>
    %200 = vector.shape_cast %199 : vector<1x1x8xf32> to vector<1x8xf32>
    %cst_151 = arith.constant 0.000000e+00 : f32
    %201 = vector.broadcast %cst_151 : f32 to vector<8x32xf32>
    %202 = vector.extract_strided_slice %18 {offsets = [8, 0], sizes = [8, 8], strides = [1, 1]} : vector<16x8xf32> to vector<8x8xf32>
    %203 = vector.extract_strided_slice %25 {offsets = [8, 0], sizes = [8, 8], strides = [1, 1]} : vector<16x8xf32> to vector<8x8xf32>
    %204 = vector.extract_strided_slice %32 {offsets = [8, 0], sizes = [8, 8], strides = [1, 1]} : vector<16x8xf32> to vector<8x8xf32>
    %205 = tpu.transpose %203, [1, 0] : vector<8x8xf32> -> vector<8x8xf32>
    %cst_152 = arith.constant dense<0.000000e+00> : vector<8x8xf32>
    %206 = tpu.matmul %202, %205, %cst_152 {dimension_numbers = #tpu.dot_dimension_numbers<[1], [0], [0], [1], [0, 0, 1, 1], [], []>} : vector<8x8xf32>, vector<8x8xf32>, vector<8x8xf32> -> vector<8x8xf32>
    %cst_153 = arith.constant 0.353553385 : f32
    %207 = vector.broadcast %cst_153 : f32 to vector<8x8xf32>
    %208 = arith.mulf %206, %207 : vector<8x8xf32>
    %209 = vector.broadcast %200 : vector<1x8xf32> to vector<8x8xf32>
    %210 = arith.addf %208, %209 : vector<8x8xf32>
    %cst_154 = arith.constant dense<0xFF800000> : vector<8xf32>
    %211 = vector.multi_reduction <maximumf>, %210, %cst_154 [1] : vector<8x8xf32> to vector<8xf32>
    %212 = vector.shape_cast %211 : vector<8xf32> to vector<8x1xf32>
    %213 = vector.broadcast %212 : vector<8x1xf32> to vector<8x8xf32>
    %214 = arith.subf %210, %213 : vector<8x8xf32>
    %215 = math.exp %214 : vector<8x8xf32>
    %cst_155 = arith.constant dense<0.000000e+00> : vector<8xf32>
    %216 = vector.multi_reduction <add>, %215, %cst_155 [1] : vector<8x8xf32> to vector<8xf32>
    %217 = vector.shape_cast %216 : vector<8xf32> to vector<8x1xf32>
    %218 = tpu.reciprocal %217 {approx = true} : vector<8x1xf32> -> vector<8x1xf32>
    %219 = vector.broadcast %218 : vector<8x1xf32> to vector<8x8xf32>
    %220 = arith.mulf %215, %219 : vector<8x8xf32>
    %cst_156 = arith.constant dense<0.000000e+00> : vector<8x8xf32>
    %221 = tpu.matmul %220, %204, %cst_156 {dimension_numbers = #tpu.dot_dimension_numbers<[1], [0], [0], [1], [0, 0, 1, 1], [], []>} : vector<8x8xf32>, vector<8x8xf32>, vector<8x8xf32> -> vector<8x8xf32>
    %c0_157 = arith.constant 0 : index
    %c0_158 = arith.constant 0 : index
    %c0_159 = arith.constant 0 : index
    %c0_160 = arith.constant 0 : index
    %222 = vector.load %arg6[%c0_157, %c0_158, %c0_159, %c0_160] : memref<1x4x8x32xf32, #tpu.memory_space<vmem>>, vector<1x1x8x32xf32>
    %223 = vector.shape_cast %222 : vector<1x1x8x32xf32> to vector<8x32xf32>
    %cst_161 = arith.constant dense<0.000000e+00> : vector<8x32xf32>
    %224 = tpu.matmul %221, %223, %cst_161 {dimension_numbers = #tpu.dot_dimension_numbers<[1], [0], [0], [1], [0, 0, 1, 1], [], []>} : vector<8x8xf32>, vector<8x32xf32>, vector<8x32xf32> -> vector<8x32xf32>
    %225 = arith.addf %201, %224 : vector<8x32xf32>
    %226 = vector.extract_strided_slice %39 {offsets = [8, 0], sizes = [8, 8], strides = [1, 1]} : vector<16x8xf32> to vector<8x8xf32>
    %227 = vector.extract_strided_slice %46 {offsets = [8, 0], sizes = [8, 8], strides = [1, 1]} : vector<16x8xf32> to vector<8x8xf32>
    %228 = vector.extract_strided_slice %53 {offsets = [8, 0], sizes = [8, 8], strides = [1, 1]} : vector<16x8xf32> to vector<8x8xf32>
    %229 = tpu.transpose %227, [1, 0] : vector<8x8xf32> -> vector<8x8xf32>
    %cst_162 = arith.constant dense<0.000000e+00> : vector<8x8xf32>
    %230 = tpu.matmul %226, %229, %cst_162 {dimension_numbers = #tpu.dot_dimension_numbers<[1], [0], [0], [1], [0, 0, 1, 1], [], []>} : vector<8x8xf32>, vector<8x8xf32>, vector<8x8xf32> -> vector<8x8xf32>
    %cst_163 = arith.constant 0.353553385 : f32
    %231 = vector.broadcast %cst_163 : f32 to vector<8x8xf32>
    %232 = arith.mulf %230, %231 : vector<8x8xf32>
    %233 = vector.broadcast %200 : vector<1x8xf32> to vector<8x8xf32>
    %234 = arith.addf %232, %233 : vector<8x8xf32>
    %cst_164 = arith.constant dense<0xFF800000> : vector<8xf32>
    %235 = vector.multi_reduction <maximumf>, %234, %cst_164 [1] : vector<8x8xf32> to vector<8xf32>
    %236 = vector.shape_cast %235 : vector<8xf32> to vector<8x1xf32>
    %237 = vector.broadcast %236 : vector<8x1xf32> to vector<8x8xf32>
    %238 = arith.subf %234, %237 : vector<8x8xf32>
    %239 = math.exp %238 : vector<8x8xf32>
    %cst_165 = arith.constant dense<0.000000e+00> : vector<8xf32>
    %240 = vector.multi_reduction <add>, %239, %cst_165 [1] : vector<8x8xf32> to vector<8xf32>
    %241 = vector.shape_cast %240 : vector<8xf32> to vector<8x1xf32>
    %242 = tpu.reciprocal %241 {approx = true} : vector<8x1xf32> -> vector<8x1xf32>
    %243 = vector.broadcast %242 : vector<8x1xf32> to vector<8x8xf32>
    %244 = arith.mulf %239, %243 : vector<8x8xf32>
    %cst_166 = arith.constant dense<0.000000e+00> : vector<8x8xf32>
    %245 = tpu.matmul %244, %228, %cst_166 {dimension_numbers = #tpu.dot_dimension_numbers<[1], [0], [0], [1], [0, 0, 1, 1], [], []>} : vector<8x8xf32>, vector<8x8xf32>, vector<8x8xf32> -> vector<8x8xf32>
    %c0_167 = arith.constant 0 : index
    %c1_168 = arith.constant 1 : index
    %c0_169 = arith.constant 0 : index
    %c0_170 = arith.constant 0 : index
    %246 = vector.load %arg6[%c0_167, %c1_168, %c0_169, %c0_170] : memref<1x4x8x32xf32, #tpu.memory_space<vmem>>, vector<1x1x8x32xf32>
    %247 = vector.shape_cast %246 : vector<1x1x8x32xf32> to vector<8x32xf32>
    %cst_171 = arith.constant dense<0.000000e+00> : vector<8x32xf32>
    %248 = tpu.matmul %245, %247, %cst_171 {dimension_numbers = #tpu.dot_dimension_numbers<[1], [0], [0], [1], [0, 0, 1, 1], [], []>} : vector<8x8xf32>, vector<8x32xf32>, vector<8x32xf32> -> vector<8x32xf32>
    %249 = arith.addf %225, %248 : vector<8x32xf32>
    %250 = vector.extract_strided_slice %60 {offsets = [8, 0], sizes = [8, 8], strides = [1, 1]} : vector<16x8xf32> to vector<8x8xf32>
    %251 = vector.extract_strided_slice %67 {offsets = [8, 0], sizes = [8, 8], strides = [1, 1]} : vector<16x8xf32> to vector<8x8xf32>
    %252 = vector.extract_strided_slice %74 {offsets = [8, 0], sizes = [8, 8], strides = [1, 1]} : vector<16x8xf32> to vector<8x8xf32>
    %253 = tpu.transpose %251, [1, 0] : vector<8x8xf32> -> vector<8x8xf32>
    %cst_172 = arith.constant dense<0.000000e+00> : vector<8x8xf32>
    %254 = tpu.matmul %250, %253, %cst_172 {dimension_numbers = #tpu.dot_dimension_numbers<[1], [0], [0], [1], [0, 0, 1, 1], [], []>} : vector<8x8xf32>, vector<8x8xf32>, vector<8x8xf32> -> vector<8x8xf32>
    %cst_173 = arith.constant 0.353553385 : f32
    %255 = vector.broadcast %cst_173 : f32 to vector<8x8xf32>
    %256 = arith.mulf %254, %255 : vector<8x8xf32>
    %257 = vector.broadcast %200 : vector<1x8xf32> to vector<8x8xf32>
    %258 = arith.addf %256, %257 : vector<8x8xf32>
    %cst_174 = arith.constant dense<0xFF800000> : vector<8xf32>
    %259 = vector.multi_reduction <maximumf>, %258, %cst_174 [1] : vector<8x8xf32> to vector<8xf32>
    %260 = vector.shape_cast %259 : vector<8xf32> to vector<8x1xf32>
    %261 = vector.broadcast %260 : vector<8x1xf32> to vector<8x8xf32>
    %262 = arith.subf %258, %261 : vector<8x8xf32>
    %263 = math.exp %262 : vector<8x8xf32>
    %cst_175 = arith.constant dense<0.000000e+00> : vector<8xf32>
    %264 = vector.multi_reduction <add>, %263, %cst_175 [1] : vector<8x8xf32> to vector<8xf32>
    %265 = vector.shape_cast %264 : vector<8xf32> to vector<8x1xf32>
    %266 = tpu.reciprocal %265 {approx = true} : vector<8x1xf32> -> vector<8x1xf32>
    %267 = vector.broadcast %266 : vector<8x1xf32> to vector<8x8xf32>
    %268 = arith.mulf %263, %267 : vector<8x8xf32>
    %cst_176 = arith.constant dense<0.000000e+00> : vector<8x8xf32>
    %269 = tpu.matmul %268, %252, %cst_176 {dimension_numbers = #tpu.dot_dimension_numbers<[1], [0], [0], [1], [0, 0, 1, 1], [], []>} : vector<8x8xf32>, vector<8x8xf32>, vector<8x8xf32> -> vector<8x8xf32>
    %c0_177 = arith.constant 0 : index
    %c2_178 = arith.constant 2 : index
    %c0_179 = arith.constant 0 : index
    %c0_180 = arith.constant 0 : index
    %270 = vector.load %arg6[%c0_177, %c2_178, %c0_179, %c0_180] : memref<1x4x8x32xf32, #tpu.memory_space<vmem>>, vector<1x1x8x32xf32>
    %271 = vector.shape_cast %270 : vector<1x1x8x32xf32> to vector<8x32xf32>
    %cst_181 = arith.constant dense<0.000000e+00> : vector<8x32xf32>
    %272 = tpu.matmul %269, %271, %cst_181 {dimension_numbers = #tpu.dot_dimension_numbers<[1], [0], [0], [1], [0, 0, 1, 1], [], []>} : vector<8x8xf32>, vector<8x32xf32>, vector<8x32xf32> -> vector<8x32xf32>
    %273 = arith.addf %249, %272 : vector<8x32xf32>
    %274 = vector.extract_strided_slice %81 {offsets = [8, 0], sizes = [8, 8], strides = [1, 1]} : vector<16x8xf32> to vector<8x8xf32>
    %275 = vector.extract_strided_slice %88 {offsets = [8, 0], sizes = [8, 8], strides = [1, 1]} : vector<16x8xf32> to vector<8x8xf32>
    %276 = vector.extract_strided_slice %95 {offsets = [8, 0], sizes = [8, 8], strides = [1, 1]} : vector<16x8xf32> to vector<8x8xf32>
    %277 = tpu.transpose %275, [1, 0] : vector<8x8xf32> -> vector<8x8xf32>
    %cst_182 = arith.constant dense<0.000000e+00> : vector<8x8xf32>
    %278 = tpu.matmul %274, %277, %cst_182 {dimension_numbers = #tpu.dot_dimension_numbers<[1], [0], [0], [1], [0, 0, 1, 1], [], []>} : vector<8x8xf32>, vector<8x8xf32>, vector<8x8xf32> -> vector<8x8xf32>
    %cst_183 = arith.constant 0.353553385 : f32
    %279 = vector.broadcast %cst_183 : f32 to vector<8x8xf32>
    %280 = arith.mulf %278, %279 : vector<8x8xf32>
    %281 = vector.broadcast %200 : vector<1x8xf32> to vector<8x8xf32>
    %282 = arith.addf %280, %281 : vector<8x8xf32>
    %cst_184 = arith.constant dense<0xFF800000> : vector<8xf32>
    %283 = vector.multi_reduction <maximumf>, %282, %cst_184 [1] : vector<8x8xf32> to vector<8xf32>
    %284 = vector.shape_cast %283 : vector<8xf32> to vector<8x1xf32>
    %285 = vector.broadcast %284 : vector<8x1xf32> to vector<8x8xf32>
    %286 = arith.subf %282, %285 : vector<8x8xf32>
    %287 = math.exp %286 : vector<8x8xf32>
    %cst_185 = arith.constant dense<0.000000e+00> : vector<8xf32>
    %288 = vector.multi_reduction <add>, %287, %cst_185 [1] : vector<8x8xf32> to vector<8xf32>
    %289 = vector.shape_cast %288 : vector<8xf32> to vector<8x1xf32>
    %290 = tpu.reciprocal %289 {approx = true} : vector<8x1xf32> -> vector<8x1xf32>
    %291 = vector.broadcast %290 : vector<8x1xf32> to vector<8x8xf32>
    %292 = arith.mulf %287, %291 : vector<8x8xf32>
    %cst_186 = arith.constant dense<0.000000e+00> : vector<8x8xf32>
    %293 = tpu.matmul %292, %276, %cst_186 {dimension_numbers = #tpu.dot_dimension_numbers<[1], [0], [0], [1], [0, 0, 1, 1], [], []>} : vector<8x8xf32>, vector<8x8xf32>, vector<8x8xf32> -> vector<8x8xf32>
    %c0_187 = arith.constant 0 : index
    %c3_188 = arith.constant 3 : index
    %c0_189 = arith.constant 0 : index
    %c0_190 = arith.constant 0 : index
    %294 = vector.load %arg6[%c0_187, %c3_188, %c0_189, %c0_190] : memref<1x4x8x32xf32, #tpu.memory_space<vmem>>, vector<1x1x8x32xf32>
    %295 = vector.shape_cast %294 : vector<1x1x8x32xf32> to vector<8x32xf32>
    %cst_191 = arith.constant dense<0.000000e+00> : vector<8x32xf32>
    %296 = tpu.matmul %293, %295, %cst_191 {dimension_numbers = #tpu.dot_dimension_numbers<[1], [0], [0], [1], [0, 0, 1, 1], [], []>} : vector<8x8xf32>, vector<8x32xf32>, vector<8x32xf32> -> vector<8x32xf32>
    %297 = arith.addf %273, %296 : vector<8x32xf32>
    %298 = vector.broadcast %97 : vector<1x32xf32> to vector<8x32xf32>
    %299 = arith.addf %297, %298 : vector<8x32xf32>
    %300 = tpu.concatenate %198, %299 in 0 : vector<8x32xf32>, vector<8x32xf32> -> vector<16x32xf32>
    %c0_192 = arith.constant 0 : index
    %c1_193 = arith.constant 1 : index
    %c0_194 = arith.constant 0 : index
    %c0_195 = arith.constant 0 : index
    %301 = vector.load %arg10[%c0_192, %c1_193, %c0_194, %c0_195] : memref<1x6x1x32xf32, #tpu.memory_space<vmem>>, vector<1x1x1x32xf32>
    %302 = vector.shape_cast %301 : vector<1x1x1x32xf32> to vector<1x32xf32>
    %c0_196 = arith.constant 0 : index
    %c2_197 = arith.constant 2 : index
    %c0_198 = arith.constant 0 : index
    %c0_199 = arith.constant 0 : index
    %303 = vector.load %arg10[%c0_196, %c2_197, %c0_198, %c0_199] : memref<1x6x1x32xf32, #tpu.memory_space<vmem>>, vector<1x1x1x32xf32>
    %304 = vector.shape_cast %303 : vector<1x1x1x32xf32> to vector<1x32xf32>
    %305 = arith.addf %3, %300 : vector<16x32xf32>
    %cst_200 = arith.constant dense<0.000000e+00> : vector<16xf32>
    %306 = vector.multi_reduction <add>, %305, %cst_200 [1] : vector<16x32xf32> to vector<16xf32>
    %307 = vector.shape_cast %306 : vector<16xf32> to vector<16x1xf32>
    %cst_201 = arith.constant 3.200000e+01 : f32
    %308 = vector.broadcast %cst_201 : f32 to vector<16x1xf32>
    %309 = arith.divf %307, %308 : vector<16x1xf32>
    %310 = vector.broadcast %309 : vector<16x1xf32> to vector<16x32xf32>
    %311 = arith.subf %305, %310 : vector<16x32xf32>
    %312 = arith.mulf %311, %311 : vector<16x32xf32>
    %cst_202 = arith.constant dense<0.000000e+00> : vector<16xf32>
    %313 = vector.multi_reduction <add>, %312, %cst_202 [1] : vector<16x32xf32> to vector<16xf32>
    %314 = vector.shape_cast %313 : vector<16xf32> to vector<16x1xf32>
    %cst_203 = arith.constant 3.200000e+01 : f32
    %315 = vector.broadcast %cst_203 : f32 to vector<16x1xf32>
    %316 = arith.divf %314, %315 : vector<16x1xf32>
    %317 = vector.broadcast %309 : vector<16x1xf32> to vector<16x32xf32>
    %318 = arith.subf %305, %317 : vector<16x32xf32>
    %cst_204 = arith.constant 9.99999974E-6 : f32
    %319 = vector.broadcast %cst_204 : f32 to vector<16x1xf32>
    %320 = arith.addf %316, %319 : vector<16x1xf32>
    %321 = math.rsqrt %320 : vector<16x1xf32>
    %322 = vector.broadcast %321 : vector<16x1xf32> to vector<16x32xf32>
    %323 = arith.mulf %318, %322 : vector<16x32xf32>
    %324 = vector.broadcast %302 : vector<1x32xf32> to vector<16x32xf32>
    %325 = arith.mulf %323, %324 : vector<16x32xf32>
    %326 = vector.broadcast %304 : vector<1x32xf32> to vector<16x32xf32>
    %327 = arith.addf %325, %326 : vector<16x32xf32>
    %c0_205 = arith.constant 0 : index
    %c0_206 = arith.constant 0 : index
    %c0_207 = arith.constant 0 : index
    %328 = vector.load %arg7[%c0_205, %c0_206, %c0_207] : memref<1x32x64xf32, #tpu.memory_space<vmem>>, vector<1x32x64xf32>
    %329 = vector.shape_cast %328 : vector<1x32x64xf32> to vector<32x64xf32>
    %cst_208 = arith.constant dense<0.000000e+00> : vector<16x64xf32>
    %330 = tpu.matmul %327, %329, %cst_208 {dimension_numbers = #tpu.dot_dimension_numbers<[1], [0], [0], [1], [0, 0, 1, 1], [], []>} : vector<16x32xf32>, vector<32x64xf32>, vector<16x64xf32> -> vector<16x64xf32>
    %c0_209 = arith.constant 0 : index
    %c0_210 = arith.constant 0 : index
    %c0_211 = arith.constant 0 : index
    %331 = vector.load %arg8[%c0_209, %c0_210, %c0_211] : memref<1x1x64xf32, #tpu.memory_space<vmem>>, vector<1x1x64xf32>
    %332 = vector.shape_cast %331 : vector<1x1x64xf32> to vector<1x64xf32>
    %333 = vector.broadcast %332 : vector<1x64xf32> to vector<16x64xf32>
    %334 = arith.addf %330, %333 : vector<16x64xf32>
    %cst_212 = arith.constant 0.000000e+00 : f32
    %335 = vector.broadcast %cst_212 : f32 to vector<16x64xf32>
    %336 = arith.maximumf %334, %335 : vector<16x64xf32>
    %c0_213 = arith.constant 0 : index
    %c0_214 = arith.constant 0 : index
    %c0_215 = arith.constant 0 : index
    %337 = vector.load %arg9[%c0_213, %c0_214, %c0_215] : memref<1x64x32xf32, #tpu.memory_space<vmem>>, vector<1x64x32xf32>
    %338 = vector.shape_cast %337 : vector<1x64x32xf32> to vector<64x32xf32>
    %cst_216 = arith.constant dense<0.000000e+00> : vector<16x32xf32>
    %339 = tpu.matmul %336, %338, %cst_216 {dimension_numbers = #tpu.dot_dimension_numbers<[1], [0], [0], [1], [0, 0, 1, 1], [], []>} : vector<16x64xf32>, vector<64x32xf32>, vector<16x32xf32> -> vector<16x32xf32>
    %c0_217 = arith.constant 0 : index
    %c3_218 = arith.constant 3 : index
    %c0_219 = arith.constant 0 : index
    %c0_220 = arith.constant 0 : index
    %340 = vector.load %arg10[%c0_217, %c3_218, %c0_219, %c0_220] : memref<1x6x1x32xf32, #tpu.memory_space<vmem>>, vector<1x1x1x32xf32>
    %341 = vector.shape_cast %340 : vector<1x1x1x32xf32> to vector<1x32xf32>
    %342 = vector.broadcast %341 : vector<1x32xf32> to vector<16x32xf32>
    %343 = arith.addf %339, %342 : vector<16x32xf32>
    %c0_221 = arith.constant 0 : index
    %c4_222 = arith.constant 4 : index
    %c0_223 = arith.constant 0 : index
    %c0_224 = arith.constant 0 : index
    %344 = vector.load %arg10[%c0_221, %c4_222, %c0_223, %c0_224] : memref<1x6x1x32xf32, #tpu.memory_space<vmem>>, vector<1x1x1x32xf32>
    %345 = vector.shape_cast %344 : vector<1x1x1x32xf32> to vector<1x32xf32>
    %c0_225 = arith.constant 0 : index
    %c5_226 = arith.constant 5 : index
    %c0_227 = arith.constant 0 : index
    %c0_228 = arith.constant 0 : index
    %346 = vector.load %arg10[%c0_225, %c5_226, %c0_227, %c0_228] : memref<1x6x1x32xf32, #tpu.memory_space<vmem>>, vector<1x1x1x32xf32>
    %347 = vector.shape_cast %346 : vector<1x1x1x32xf32> to vector<1x32xf32>
    %348 = arith.addf %327, %343 : vector<16x32xf32>
    %cst_229 = arith.constant dense<0.000000e+00> : vector<16xf32>
    %349 = vector.multi_reduction <add>, %348, %cst_229 [1] : vector<16x32xf32> to vector<16xf32>
    %350 = vector.shape_cast %349 : vector<16xf32> to vector<16x1xf32>
    %cst_230 = arith.constant 3.200000e+01 : f32
    %351 = vector.broadcast %cst_230 : f32 to vector<16x1xf32>
    %352 = arith.divf %350, %351 : vector<16x1xf32>
    %353 = vector.broadcast %352 : vector<16x1xf32> to vector<16x32xf32>
    %354 = arith.subf %348, %353 : vector<16x32xf32>
    %355 = arith.mulf %354, %354 : vector<16x32xf32>
    %cst_231 = arith.constant dense<0.000000e+00> : vector<16xf32>
    %356 = vector.multi_reduction <add>, %355, %cst_231 [1] : vector<16x32xf32> to vector<16xf32>
    %357 = vector.shape_cast %356 : vector<16xf32> to vector<16x1xf32>
    %cst_232 = arith.constant 3.200000e+01 : f32
    %358 = vector.broadcast %cst_232 : f32 to vector<16x1xf32>
    %359 = arith.divf %357, %358 : vector<16x1xf32>
    %360 = vector.broadcast %352 : vector<16x1xf32> to vector<16x32xf32>
    %361 = arith.subf %348, %360 : vector<16x32xf32>
    %cst_233 = arith.constant 9.99999974E-6 : f32
    %362 = vector.broadcast %cst_233 : f32 to vector<16x1xf32>
    %363 = arith.addf %359, %362 : vector<16x1xf32>
    %364 = math.rsqrt %363 : vector<16x1xf32>
    %365 = vector.broadcast %364 : vector<16x1xf32> to vector<16x32xf32>
    %366 = arith.mulf %361, %365 : vector<16x32xf32>
    %367 = vector.broadcast %345 : vector<1x32xf32> to vector<16x32xf32>
    %368 = arith.mulf %366, %367 : vector<16x32xf32>
    %369 = vector.broadcast %347 : vector<1x32xf32> to vector<16x32xf32>
    %370 = arith.addf %368, %369 : vector<16x32xf32>
    %c0_234 = arith.constant 0 : index
    %c0_235 = arith.constant 0 : index
    %371 = vector.load %arg12[%c0_234, %c0_235] : memref<16x32xf32, #tpu.memory_space<vmem>>, vector<16x32xf32>
    tpu.vector_store %arg12[%c0_234, %c0_235], %370 {strides = array<i32>} : memref<16x32xf32, #tpu.memory_space<vmem>>, vector<16x32xf32>,
    %c1_i32 = arith.constant 1 : i32
    %372 = arith.cmpi eq, %arg0, %c1_i32 : i32
    %373 = arith.extui %372 : i1 to i32
    %c0_i32_236 = arith.constant 0 : i32
    %374 = arith.cmpi ne, %373, %c0_i32_236 : i32
    scf.if %374 {
      %375 = vector.shape_cast %370 : vector<16x32xf32> to vector<2x8x32xf32>
      %c0_237 = arith.constant 0 : index
      %c0_238 = arith.constant 0 : index
      %c0_239 = arith.constant 0 : index
      %376 = vector.load %arg11[%c0_237, %c0_238, %c0_239] : memref<2x8x32xf32, #tpu.memory_space<vmem>>, vector<2x8x32xf32>
      tpu.vector_store %arg11[%c0_237, %c0_238, %c0_239], %375 {strides = array<i32>} : memref<2x8x32xf32, #tpu.memory_space<vmem>>, vector<2x8x32xf32>,
    } else {
    }
    return
  }
  func.func @transform_0(%arg0: i32) -> (i32, i32, i32) {
    %c0_i32 = arith.constant 0 : i32
    %c0_i32_0 = arith.constant 0 : i32
    %c0_i32_1 = arith.constant 0 : i32
    %c0_i32_2 = arith.constant 0 : i32
    return %c0_i32, %c0_i32_0, %c0_i32_1 : i32, i32, i32
  }
  func.func @transform_1(%arg0: i32) -> (i32, i32, i32) {
    %c0_i32 = arith.constant 0 : i32
    %c0_i32_0 = arith.constant 0 : i32
    %c0_i32_1 = arith.constant 0 : i32
    %c0_i32_2 = arith.constant 0 : i32
    return %c0_i32, %c0_i32_0, %c0_i32_1 : i32, i32, i32
  }
  func.func @transform_2(%arg0: i32) -> (i32, i32, i32) {
    %c0_i32 = arith.constant 0 : i32
    %c0_i32_0 = arith.constant 0 : i32
    %c0_i32_1 = arith.constant 0 : i32
    %c0_i32_2 = arith.constant 0 : i32
    return %c0_i32, %c0_i32_0, %c0_i32_1 : i32, i32, i32
  }
  func.func @transform_3(%arg0: i32) -> (i32, i32, i32, i32) {
    %c0_i32 = arith.constant 0 : i32
    %c0_i32_0 = arith.constant 0 : i32
    %c0_i32_1 = arith.constant 0 : i32
    %c0_i32_2 = arith.constant 0 : i32
    return %arg0, %c0_i32, %c0_i32_0, %c0_i32_1 : i32, i32, i32, i32
  }
  func.func @transform_4(%arg0: i32) -> (i32, i32, i32, i32) {
    %c0_i32 = arith.constant 0 : i32
    %c0_i32_0 = arith.constant 0 : i32
    %c0_i32_1 = arith.constant 0 : i32
    %c0_i32_2 = arith.constant 0 : i32
    return %arg0, %c0_i32, %c0_i32_0, %c0_i32_1 : i32, i32, i32, i32
  }
  func.func @transform_5(%arg0: i32) -> (i32, i32, i32, i32) {
    %c0_i32 = arith.constant 0 : i32
    %c0_i32_0 = arith.constant 0 : i32
    %c0_i32_1 = arith.constant 0 : i32
    %c0_i32_2 = arith.constant 0 : i32
    return %arg0, %c0_i32, %c0_i32_0, %c0_i32_1 : i32, i32, i32, i32
  }
  func.func @transform_6(%arg0: i32) -> (i32, i32, i32) {
    %c0_i32 = arith.constant 0 : i32
    %c0_i32_0 = arith.constant 0 : i32
    %c0_i32_1 = arith.constant 0 : i32
    return %arg0, %c0_i32, %c0_i32_0 : i32, i32, i32
  }
  func.func @transform_7(%arg0: i32) -> (i32, i32, i32) {
    %c0_i32 = arith.constant 0 : i32
    %c0_i32_0 = arith.constant 0 : i32
    %c0_i32_1 = arith.constant 0 : i32
    return %arg0, %c0_i32, %c0_i32_0 : i32, i32, i32
  }
  func.func @transform_8(%arg0: i32) -> (i32, i32, i32) {
    %c0_i32 = arith.constant 0 : i32
    %c0_i32_0 = arith.constant 0 : i32
    %c0_i32_1 = arith.constant 0 : i32
    return %arg0, %c0_i32, %c0_i32_0 : i32, i32, i32
  }
  func.func @transform_9(%arg0: i32) -> (i32, i32, i32, i32) {
    %c0_i32 = arith.constant 0 : i32
    %c0_i32_0 = arith.constant 0 : i32
    %c0_i32_1 = arith.constant 0 : i32
    %c0_i32_2 = arith.constant 0 : i32
    return %arg0, %c0_i32, %c0_i32_0, %c0_i32_1 : i32, i32, i32, i32
  }
  func.func @transform_10(%arg0: i32) -> (i32, i32, i32) {
    %c0_i32 = arith.constant 0 : i32
    %c0_i32_0 = arith.constant 0 : i32
    %c0_i32_1 = arith.constant 0 : i32
    %c0_i32_2 = arith.constant 0 : i32
    return %c0_i32, %c0_i32_0, %c0_i32_1 : i32, i32, i32
  }
}

</mosaic_0001>

<bundles_post_ra>
// kernel: tpu_custom_call.1
= control target key start
LH: loop header
LB: loop body
LE: loop exit
PB: predicated region body
PF: predicated region fallthrough
CT: control target
= control target key end

     0   :  { %s5211_s0 = inlined_call_operand.vmem [shape: f32[2,8,32], index: 0, kind: input, shape index: {}]   ;;  %s5212_s1 = inlined_call_operand.vmem [shape: f32[2,8,32], index: 1, kind: input, shape index: {}]   ;;  %s5213_s2 = inlined_call_operand.vmem [shape: f32[2,1,8], index: 2, kind: input, shape index: {}]   ;;  %s5214_s3 = inlined_call_operand.vmem [shape: f32[2,12,32,8], index: 3, kind: input, shape index: {}]   ;;  %s5215_s4 = inlined_call_operand.vmem [shape: f32[2,12,1,8], index: 4, kind: input, shape index: {}]   ;;  %s5216_s5 = inlined_call_operand.vmem [shape: f32[2,4,8,32], index: 5, kind: input, shape index: {}]   ;;  %s5217_s6 = inlined_call_operand.vmem [shape: f32[2,32,64], index: 6, kind: input, shape index: {}]   ;;  %s5218_s7 = inlined_call_operand.vmem [shape: f32[2,1,64], index: 7, kind: input, shape index: {}]   ;;  %s5219_s8 = inlined_call_operand.vmem [shape: f32[2,64,32], index: 8, kind: input, shape index: {}]   ;;  %s5220_s9 = inlined_call_operand.vmem [shape: f32[2,6,1,32], index: 9, kind: input, shape index: {}]   ;;  %s5221_s10 = inlined_call_operand.hbm [shape: f32[2,8,32], index: 10, kind: output, shape index: {}]  }
   0x1   :  { %5223 = sst [smem:[#allocation7_spill]] %s5216_s5 }
   0x2   :  { %15 = vsyncpa [#allocation4], 0  ;;  %s4729_s13 = smov 0  }
   0x3 LB: > { %5224 = sst [smem:[#allocation6_spill]] %s4667_s13  ;;  %s4735_s14 = sadd.s32 4294967295, %s4667_s13   ;;  %s4667_s13 = sphi %s4729_s13, %s21_s13  }
   0x4   : > { %p3872_p0 = scmp.ge.s32.totalorder %s4667_s13, 1  ;;  %p364_p1 = scmp.lt.s32.totalorder %s4667_s13, 3 }
   0x6   : > { %p365_p2 = pnand %p3872_p0, %p364_p1 }
   0x7   : > { %p423_p3 = scmp.lt.s32.totalorder (!%p365_p2), %s4735_s14, 1  ;;  %s5225_s5 = sld [smem:[#allocation7_spill]] (!%p365_p2) }
   0x8   : > { %368 = sbr.rel (%p365_p2) target bundleno = 5938 (0x1732), region = 60  ;;  %p3880_p4 = scmp.ne.s32.totalorder (!%p365_p2), %s4735_s14, 0 }
   0xf   : > { %s4741_s15 = scalar_select %p423_p3, %s4735_s14, 1 }
  0x10   : > { %v458_v0 = vld [vmem:[%s5211_s0] sm:$0xff] (!%p3880_p4)  ;;  %vm460_vm0 = vcmask (!%p3880_p4), 261120   ;;  %v459_v1 = vld [vmem:[%s5211_s0 + $0x8] sm:$0xff] (!%p3880_p4) }
  0x11   : > { %s4569_s16 = smul.u32 384, %s4741_s15  ;;  %s4028_s17 = sshll.u32 %s4741_s15, 5  ;;  %461 = vst.msk [vmem:[#allocation2] sm:$0xff] (!%p3880_p4), %vm460_vm0, %v458_v0  ;;  %462 = vst.msk [vmem:[#allocation2 + $0x8] sm:$0xff] (!%p3880_p4), %vm460_vm0, %v459_v1 }
  0x12   : > { %s4570_s18 = smul.u32 12, %s4741_s15  ;;  %s4749_s21 = scalar_lea.vmem %s5225_s5, %s4028_s17 }
  0x13   : > { %s4754_s24 = scalar_lea.vmem %s5214_s3, %s4569_s16  ;;  %s4759_s27 = scalar_lea.vmem %s5217_s6, %s4028_s17 }
  0x14   : > { %s4764_s30 = scalar_lea.vmem %s5215_s4, %s4570_s18  ;;  %s444_s19 = scalar_lea.vmem %s5218_s7, %s4741_s15 }
  0x15   : > { %s4030_s20 = sshll.u32 %s4741_s15, 6  ;;  %s4571_s5 = smul.u32 6, %s4741_s15 }
  0x16   : > { %s4775_s16 = scalar_lea.vmem %s5219_s8, %s4030_s20  ;;  %457 = sbr.rel (%p3880_p4) target bundleno = 29 (0x1d), region = 64 }
  0x17   : > { %s4780_s17 = scalar_lea.vmem %s5220_s9, %s4571_s5 }
  0x1d PF: > { %v3884_v2 = vld [vmem:[%s4754_s24 + $0x80] sm:$0xff]  ;;  %v3885_v3 = vld [vmem:[%s4754_s24 + $0x88] sm:$0xff]  ;;  %v3886_v7 = vld [vmem:[%s4754_s24 + $0x90] sm:$0xff]  ;;  %vm486_vm1 = vcmask 261120   ;;  %v4669_v50 = vmov 0.0   ;;  %vm4670_vm2 = vmmov 0  }
  0x1e   : > { %v475_v4 = vld [vmem:[%s4754_s24] sm:$0xff]  ;;  %v4457_v5 = vpack.c.bf16 %v3885_v3, %v3884_v2  ;;  %v476_v6 = vld [vmem:[%s4754_s24 + $0x8] sm:$0xff]  ;;  %v3887_v8 = vld [vmem:[%s4754_s24 + $0x98] sm:$0xff]  ;;  %vm1543_vm3 = vcmask 64512   ;;  %vm3614_vm4 = vcmask 523264   ;;  %p4023_p5 = scmp.ne.s32.totalorder %s4735_s14, 1 }
  0x1f   : > { %v4449_v9 = vpack.c.bf16 %v476_v6, %v475_v4  ;;  %v4461_v10 = vpack.c.bf16 %v3887_v8, %v3886_v7  ;;  %v477_v11 = vld [vmem:[%s4754_s24 + $0x10] sm:$0xff]  ;;  %v478_v12 = vld [vmem:[%s4754_s24 + $0x18] sm:$0xff]  ;;  %v4797_v13 = vld [vmem:[#allocation2] sm:$0xff] }
  0x20   : > { %4458 = vmatprep.subr.bf16.mxu1 %v4457_v5  ;;  %v4453_v14 = vpack.c.bf16 %v478_v12, %v477_v11  ;;  %v465_v15 = vld [vmem:[%s5212_s1] sm:$0xff]  ;;  %v4802_v16 = vld [vmem:[#allocation2 + $0x8] sm:$0xff]  ;;  %v3894_v23 = vld [vmem:[%s4754_s24 + $0x110] sm:$0xff] }
  0x21   : > { %4460 = vmatpush3.bf16.msra.mxu1 %v4457_v5  ;;  %4450 = vmatprep.subr.bf16.mxu0 %v4449_v9  ;;  %v4805_v17 = vadd.f32 %v465_v15, %v4797_v13  ;;  %v466_v18 = vld [vmem:[%s5212_s1 + $0x8] sm:$0xff]  ;;  %v3892_v19 = vld [vmem:[%s4754_s24 + $0x100] sm:$0xff]  ;;  %v3895_v24 = vld [vmem:[%s4754_s24 + $0x118] sm:$0xff] }
  0x22   : > { %v3893_v20 = vld [vmem:[%s4754_s24 + $0x108] sm:$0xff]  ;;  %4452 = vmatpush3.bf16.msra.mxu0 %v4449_v9  ;;  %4462 = vmatprep.subr.bf16.mxu1 %v4461_v10  ;;  %v4815_v22 = vadd.f32 %v466_v18, %v4802_v16  ;;  %v4469_v25 = vpack.c.bf16 %v3895_v24, %v3894_v23  ;;  %v3908_v26 = vld [vmem:[%s4754_s24 + $0xa0] sm:$0xff]  ;;  %v3910_v29 = vld [vmem:[%s4754_s24 + $0xb0] sm:$0xff] }
  0x23   : > { %4454 = vmatprep.subr.bf16.mxu0 %v4453_v14  ;;  %4186 = vmatprep.mubr.msk.f32.mxu1 %vm486_vm1, %v4805_v17  ;;  %v4465_v21 = vpack.c.bf16 %v3893_v20, %v3892_v19  ;;  %v3909_v27 = vld [vmem:[%s4754_s24 + $0xa8] sm:$0xff]  ;;  %v3911_v30 = vld [vmem:[%s4754_s24 + $0xb8] sm:$0xff]  ;;  %v3924_v32 = vld [vmem:[%s4754_s24 + $0x40] sm:$0xff] }
  0x24   : > { %4175 = vmatprep.mubr.msk.f32.mxu0 %vm486_vm1, %v4805_v17  ;;  %v4481_v28 = vpack.c.bf16 %v3909_v27, %v3908_v26  ;;  %v4485_v31 = vpack.c.bf16 %v3911_v30, %v3910_v29  ;;  %v3925_v33 = vld [vmem:[%s4754_s24 + $0x48] sm:$0xff]  ;;  %v3926_v35 = vld [vmem:[%s4754_s24 + $0x50] sm:$0xff]  ;;  %v3927_v36 = vld [vmem:[%s4754_s24 + $0x58] sm:$0xff] }
  0x25   : > { %4464 = vmatpush3.bf16.msra.mxu1 %v4461_v10  ;;  %v4497_v34 = vpack.c.bf16 %v3925_v33, %v3924_v32  ;;  %v4501_v37 = vpack.c.bf16 %v3927_v36, %v3926_v35  ;;  %v3940_v38 = vld [vmem:[%s4754_s24 + $0x140] sm:$0xff]  ;;  %v3941_v39 = vld [vmem:[%s4754_s24 + $0x148] sm:$0xff]  ;;  %v3942_v41 = vld [vmem:[%s4754_s24 + $0x150] sm:$0xff] }
  0x26   : > { %4456 = vmatpush3.bf16.msra.mxu0 %v4453_v14  ;;  %v4513_v40 = vpack.c.bf16 %v3941_v39, %v3940_v38  ;;  %v3943_v42 = vld [vmem:[%s4754_s24 + $0x158] sm:$0xff]  ;;  %v3956_v44 = vld [vmem:[%s4754_s24 + $0xe0] sm:$0xff]  ;;  %v3957_v45 = vld [vmem:[%s4754_s24 + $0xe8] sm:$0xff] }
  0x27   : > { %4466 = vmatprep.subr.bf16.mxu0 %v4465_v21  ;;  %v4517_v43 = vpack.c.bf16 %v3943_v42, %v3942_v41  ;;  %v4529_v46 = vpack.c.bf16 %v3957_v45, %v3956_v44  ;;  %v3958_v47 = vld [vmem:[%s4754_s24 + $0xf0] sm:$0xff]  ;;  %v3959_v48 = vld [vmem:[%s4754_s24 + $0xf8] sm:$0xff]  ;;  %v3889_v51 = vld [vmem:[%s4764_s30 + $0x4] ss:$0 sm:$0xff] }
  0x28   : > { %4187 = vmatmul.mubr.msk.f32.vlgmr.msra.gmra.mrb[0].mxu1 %vm486_vm1, %v4815_v22  ;;  %v4533_v49 = vpack.c.bf16 %v3959_v48, %v3958_v47  ;;  %v3881_v52 = vld [vmem:[%s4764_s30] ss:$0 sm:$0xff]  ;;  %v3897_v61 = vld [vmem:[%s4764_s30 + $0x8] ss:$0 sm:$0xff]  ;;  %v3913_v2 = vld [vmem:[%s4764_s30 + $0x5] ss:$0 sm:$0xff] }
  0x29   : > { %4176 = vmatmul.mubr.msk.f32.vlgmr.msra.gmra.mrb[0].mxu0 %vm486_vm1, %v4815_v22  ;;  %4208 = vmatprep.mubr.msk.f32.mxu1 %vm486_vm1, %v4805_v17  ;;  %v4885_v6 = vld [vmem:[%s4764_s30 + $0x2] ss:$0 sm:$0xff]  ;;  %v4893_v10 = vld [vmem:[%s4764_s30 + $0xa] ss:$0 sm:$0xff]  ;;  %v4901_v15 = vld [vmem:[%s4764_s30 + $0x7] ss:$0 sm:$0xff] }
  0x2a   : > { %4468 = vmatpush3.bf16.msra.mxu0 %v4465_v21  ;;  %4197 = vmatprep.mubr.msk.f32.mxu0 %vm486_vm1, %v4797_v13  ;;  %v3900_v21 = vld [vmem:[%s4754_s24 + $0x20] sm:$0xff]  ;;  %v3901_v23 = vld [vmem:[%s4754_s24 + $0x28] sm:$0xff]  ;;  %v3902_v24 = vld [vmem:[%s4754_s24 + $0x30] sm:$0xff] }
  0x2b   : > { %4470 = vmatprep.subr.bf16.mxu0 %v4469_v25  ;;  %v3903_v26 = vld [vmem:[%s4754_s24 + $0x38] sm:$0xff]  ;;  %v467_v29 = vld [vmem:[%s5213_s2] sm:$0x1] }
  0x2c   : > { %v4477_v27 = vpack.c.bf16 %v3903_v26, %v3902_v24  ;;  %v469_v30 = vsub.f32 1.0, %v467_v29 }
  0x2e   : > { %4472 = vmatpush3.bf16.msra.mxu0 %v4469_v25  ;;  %v4473_v25 = vpack.c.bf16 %v3901_v23, %v3900_v21  ;;  %v471_v32 = vmul.f32 -1e+09, %v469_v30  ;;  %v3933_v21 = vld [vmem:[%s4754_s24 + $0xc8] sm:$0xff]  ;;  %v3934_v23 = vld [vmem:[%s4754_s24 + $0xd0] sm:$0xff] }
  0x2f   : > { %4482 = vmatprep.subr.bf16.mxu0 %v4481_v28  ;;  %v3950_v30 = vld [vmem:[%s4754_s24 + $0x70] sm:$0xff] }
  0x30   : > { %4474 = vmatprep.subr.bf16.mxu1 %v4473_v25 }
  0x31   : > { %4198 = vmatmul.mubr.msk.f32.vlgmr.msra.gmra.mrb[2].mxu0 %vm486_vm1, %v4802_v16  ;;  %4476 = vmatpush3.bf16.msra.mxu1 %v4473_v25  ;;  %v3935_v25 = vld [vmem:[%s4754_s24 + $0xd8] sm:$0xff] }
  0x32   : > { %4484 = vmatpush3.bf16.msra.mxu0 %v4481_v28  ;;  %4219 = vmatprep.mubr.msk.f32.mxu0 %vm486_vm1, %v4805_v17  ;;  %v1622_v28 = vlaneseq  ;;  %v4509_v26 = vpack.c.bf16 %v3935_v25, %v3934_v23 }
  0x33   : > { %4486 = vmatprep.subr.bf16.mxu0 %v4485_v31  ;;  %4478 = vmatprep.subr.bf16.mxu1 %v4477_v27 }
  0x35   : > { %4480 = vmatpush3.bf16.msra.mxu1 %v4477_v27  ;;  %v3948_v27 = vld [vmem:[%s4754_s24 + $0x60] sm:$0xff] }
  0x36   : > { %4488 = vmatpush3.bf16.msra.mxu0 %v4485_v31  ;;  %v4919_v31 = vshrl.u32 %v1622_v28, 7  ;;  %v3949_v28 = vld [vmem:[%s4754_s24 + $0x68] sm:$0xff] }
  0x37   : > { %4498 = vmatprep.subr.bf16.mxu0 %v4497_v34  ;;  %v4521_v29 = vpack.c.bf16 %v3949_v28, %v3948_v27 }
  0x38   : > { %4209 = vmatmul.mubr.msk.f32.vlgmr.msra.gmra.mrb[2].mxu1 %vm486_vm1, %v4815_v22  ;;  %v1624_v33 = vsub.s32 0, %v4919_v31 }
  0x39   : > { %4220 = vmatmul.mubr.msk.f32.vlgmr.msra.gmra.mrb[4].mxu0 %vm486_vm1, %v4815_v22  ;;  %4230 = vmatprep.mubr.msk.f32.mxu1 %vm486_vm1, %v4797_v13 }
  0x3a   : > { %4500 = vmatpush3.bf16.msra.mxu0 %v4497_v34  ;;  %4241 = vmatprep.mubr.msk.f32.mxu0 %vm486_vm1, %v4805_v17  ;;  %v4924_v34 = vrot.slane %v471_v32, %v1624_v33  ;;  %v3951_v32 = vld [vmem:[%s4754_s24 + $0x78] sm:$0xff] }
  0x3b   : > { %4502 = vmatprep.subr.bf16.mxu0 %v4501_v37 }
  0x3e   : > { %4504 = vmatpush3.bf16.msra.mxu0 %v4501_v37 }
  0x3f   : > { %4514 = vmatprep.subr.bf16.mxu0 %v4513_v40 }
  0x41   : > { %4242 = vmatmul.mubr.msk.f32.vlgmr.msra.gmra.mrb[6].mxu0 %vm486_vm1, %v4815_v22 }
  0x42   : > { %4516 = vmatpush3.bf16.msra.mxu0 %v4513_v40  ;;  %4263 = vmatprep.mubr.msk.f32.mxu0 %vm486_vm1, %v4797_v13 }
  0x43   : > { %4518 = vmatprep.subr.bf16.mxu0 %v4517_v43 }
  0x46   : > { %4520 = vmatpush3.bf16.msra.mxu0 %v4517_v43 }
  0x47   : > { %4530 = vmatprep.subr.bf16.mxu0 %v4529_v46 }
  0x49   : > { %4264 = vmatmul.mubr.msk.f32.vlgmr.msra.gmra.mrb[8].mxu0 %vm486_vm1, %v4802_v16 }
  0x4a   : > { %4532 = vmatpush3.bf16.msra.mxu0 %v4529_v46  ;;  %4285 = vmatprep.mubr.msk.f32.mxu0 %vm486_vm1, %v4805_v17  ;;  %v3905_v46 = vld [vmem:[%s4764_s30 + $0x1] ss:$0 sm:$0xff] }
  0x4b   : > { %4534 = vmatprep.subr.bf16.mxu0 %v4533_v49 }
  0x4e   : > { %4536 = vmatpush3.bf16.msra.mxu0 %v4533_v49 }
  0x4f   : > { %4299 = vmatprep.subr.mxu0 %v4669_v50 }
  0x51   : > { %4286 = vmatmul.mubr.msk.f32.vlgmr.msra.gmra.mrb[10].mxu0 %vm486_vm1, %v4815_v22 }
  0x52   : > { %4301 = vmatprep.mubr.msk.f32.mxu0 %vm4670_vm2, %v4669_v50 }
  0xfb   : > { %v4188_v53 = vpop.f32.mrb[0].mxu1 }
  0xfc   : > { %v4868_v54 = vadd.f32 %v4188_v53, %v3889_v51  ;;  %v647_v55 = vpop.f32.mrb[1].mxu1  ;;  %v4177_v56 = vpop.f32.mrb[0].mxu0 }
  0xfd   : > { %v648_v57 = vadd.f32 %v3889_v51, %v647_v55  ;;  %v4870_v58 = vadd.f32 %v4177_v56, %v3881_v52  ;;  %v559_v59 = vpop.f32.mrb[1].mxu0  ;;  %v3916_v56 = vld [vmem:[%s4754_s24 + $0x120] sm:$0xff] }
  0xfe   : > { %v560_v60 = vadd.f32 %v3881_v52, %v559_v59  ;;  %v3918_v59 = vld [vmem:[%s4754_s24 + $0x130] sm:$0xff] }
  0xff   : > { %4300 = vmatpush3.xpose.msk.msra.mxu0 %vm1543_vm3, %v648_v57  ;;  %v3917_v57 = vld [vmem:[%s4754_s24 + $0x128] sm:$0xff] }
 0x100   : > { %4304 = vmatprep.subr.mxu0 %v4669_v50 }
 0x102   : > { %4302 = vmatmul.mubr.msk.f32.vlgmr.msra.gmra.mrb[12].mxu0 %vm1543_vm3, %v560_v60  ;;  %v4489_v60 = vpack.c.bf16 %v3917_v57, %v3916_v56 }
 0x103   : > { %4306 = vmatprep.mubr.msk.f32.mxu0 %vm4670_vm2, %v4669_v50 }
 0x104   : > { %v4199_v62 = vpop.f32.mrb[2].mxu0  ;;  %4490 = vmatprep.subr.bf16.mxu1 %v4489_v60 }
 0x105   : > { %v4878_v63 = vadd.f32 %v4199_v62, %v3897_v61  ;;  %v741_v0 = vpop.f32.mrb[3].mxu0  ;;  %4492 = vmatpush3.bf16.msra.mxu1 %v4489_v60 }
 0x106   : > { %v742_v1 = vadd.f32 %v3897_v61, %v741_v0  ;;  %v3919_v61 = vld [vmem:[%s4754_s24 + $0x138] sm:$0xff] }
 0x107   : > { %v4493_v62 = vpack.c.bf16 %v3919_v61, %v3918_v59  ;;  %v3953_v59 = vld [vmem:[%s4764_s30 + $0x3] ss:$0 sm:$0xff] }
 0x108   : > { %4305 = vmatpush3.msra.mxu0 %v742_v1 }
 0x109   : > { %4309 = vmatprep.subr.mxu0 %v4669_v50  ;;  %4494 = vmatprep.subr.bf16.mxu1 %v4493_v62 }
 0x10a   : > { %4496 = vmatpush3.bf16.msra.mxu1 %v4493_v62 }
 0x10b   : > { %v4210_v45 = vpop.f32.mrb[2].mxu1 }
 0x10c   : > { %v4221_v3 = vpop.f32.mrb[4].mxu0  ;;  %v4930_v47 = vadd.f32 %v4210_v45, %v3905_v46  ;;  %v829_v48 = vpop.f32.mrb[3].mxu1 }
 0x10d   : > { %v4882_v4 = vadd.f32 %v4221_v3, %v3913_v2  ;;  %v917_v5 = vpop.f32.mrb[5].mxu0  ;;  %v830_v55 = vadd.f32 %v3905_v46, %v829_v48  ;;  %4231 = vmatmul.mubr.msk.f32.vlgmr.msra.gmra.mrb[4].mxu1 %vm486_vm1, %v4802_v16  ;;  %v3921_v46 = vld [vmem:[%s4764_s30 + $0x9] ss:$0 sm:$0xff] }
 0x10e   : > { %v918_v53 = vadd.f32 %v3913_v2, %v917_v5  ;;  %4252 = vmatprep.mubr.msk.f32.mxu1 %vm486_vm1, %v4805_v17 }
 0x114   : > { %v4243_v7 = vpop.f32.mrb[6].mxu0 }
 0x115   : > { %v4888_v8 = vadd.f32 %v4243_v7, %v4885_v6  ;;  %v4890_v9 = vpop.f32.mrb[7].mxu0 }
 0x11c   : > { %v4265_v11 = vpop.f32.mrb[8].mxu0 }
 0x11d   : > { %v4896_v12 = vadd.f32 %v4265_v11, %v4893_v10  ;;  %v4898_v14 = vpop.f32.mrb[9].mxu0 }
 0x124   : > { %v4287_v18 = vpop.f32.mrb[10].mxu0 }
 0x125   : > { %v4904_v19 = vadd.f32 %v4287_v18, %v4901_v15  ;;  %v4906_v20 = vpop.f32.mrb[11].mxu0  ;;  %v3932_v18 = vld [vmem:[%s4754_s24 + $0xc0] sm:$0xff] }
 0x126   : > { %v4505_v24 = vpack.c.bf16 %v3933_v21, %v3932_v18 }
 0x128   : > { %4506 = vmatprep.subr.bf16.mxu1 %v4505_v24 }
 0x129   : > { %4508 = vmatpush3.bf16.msra.mxu1 %v4505_v24 }
 0x12a   : > { %4510 = vmatprep.subr.bf16.mxu1 %v4509_v26 }
 0x12d   : > { %4512 = vmatpush3.bf16.msra.mxu1 %v4509_v26 }
 0x12e   : > { %4522 = vmatprep.subr.bf16.mxu1 %v4521_v29 }
 0x130   : > { %4253 = vmatmul.mubr.msk.f32.vlgmr.msra.gmra.mrb[6].mxu1 %vm486_vm1, %v4815_v22 }
 0x131   : > { %4524 = vmatpush3.bf16.msra.mxu1 %v4521_v29  ;;  %4274 = vmatprep.mubr.msk.f32.mxu1 %vm486_vm1, %v4805_v17  ;;  %v3964_v17 = vld [vmem:[%s4754_s24 + $0x160] sm:$0xff] }
 0x1d5   : > { %v1616_v35 = vpop.f32.mrb[12].mxu0 }
 0x1d6   : > { %v1620_v36 = vmul.f32 0.35355338, %v1616_v35  ;;  %v4303_v37 = vpop.f32.mrb[13].mxu0  ;;  %v4525_v35 = vpack.c.bf16 %v3951_v32, %v3950_v30 }
 0x1d8   : > { %v1627_v38 = vadd.f32 %v4924_v34, %v1620_v36  ;;  %4526 = vmatprep.subr.bf16.mxu1 %v4525_v35 }
 0x1d9   : > { %4528 = vmatpush3.bf16.msra.mxu1 %v4525_v35 }
 0x1da   : > { %v1628_v39 = vsel %vm1543_vm3, %v1627_v38, -inf }
 0x1db   : > { %1629 = vmax.xlane.f32.xlu0 %v1628_v39 }
 0x1dc   : > { %4275 = vmatmul.mubr.msk.f32.vlgmr.msra.gmra.mrb[8].mxu1 %vm486_vm1, %v4815_v22  ;;  %v3967_v22 = vld [vmem:[%s4754_s24 + $0x178] sm:$0xff] }
 0x1dd   : > { %4296 = vmatprep.mubr.msk.f32.mxu1 %vm486_vm1, %v4797_v13 }
 0x1e0   : > { %v4232_v45 = vpop.f32.mrb[4].mxu1 }
 0x1e1   : > { %v1005_v48 = vpop.f32.mrb[5].mxu1 }
 0x268   : > { %v1630_v40 = vpop.xlane.xlu0 %1629 }
 0x269   : > { %v1631_v41 = vsub.f32 %v1627_v38, %v1630_v40 }
 0x26b   : > { %v1632_v42 = vmul.f32 1.442695, %v1631_v41  ;;  %v3965_v41 = vld [vmem:[%s4754_s24 + $0x168] sm:$0xff] }
 0x26d   : > { %4591 = vpow2.f32 %v1632_v42  ;;  %v4537_v42 = vpack.c.bf16 %v3965_v41, %v3964_v17  ;;  %v5025_v17 = vld [vmem:[%s4749_s21 + $0x10] sm:$0xff] }
 0x26f   : > { %4538 = vmatprep.subr.bf16.mxu1 %v4537_v42 }
 0x270   : > { %4540 = vmatpush3.bf16.msra.mxu1 %v4537_v42 }
 0x277   : > { %v4592_v43 = vpop.eup %4591 }
 0x278   : > { %v1634_v44 = vsel %vm1543_vm3, %v4592_v43, 0.0 }
 0x279   : > { %1635 = vadd.xlane.f32.xlu0 %v1634_v44 }
 0x306   : > { %v1636_v49 = vpop.xlane.xlu0 %1635 }
 0x307   : > { %4593 = vrcp.f32 %v1636_v49  ;;  %v4977_v49 = vadd.f32 %v4232_v45, %v3921_v46 }
 0x311   : > { %v4594_v51 = vpop.eup %4593 }
 0x312   : > { %v1638_v52 = vmul.f32 %v4594_v51, %v4592_v43  ;;  %v3966_v43 = vld [vmem:[%s4754_s24 + $0x170] sm:$0xff]  ;;  %v1006_v51 = vadd.f32 %v3921_v46, %v1005_v48 }
 0x313   : > { %v4541_v44 = vpack.c.bf16 %v3967_v22, %v3966_v43  ;;  %v1446_v22 = vadd.f32 %v4901_v15, %v4906_v20 }
 0x314   : > { %4307 = vmatmul.mubr.msk.f32.vlgmr.msra.gmra.mrb[14].mxu0 %vm1543_vm3, %v1638_v52  ;;  %v4983_v52 = vld [vmem:[%s4749_s21 + $0x8] sm:$0xff] }
 0x315   : > { %4310 = vmatpush3.xpose.msk.msra.mxu0 %vm1543_vm3, %v918_v53  ;;  %4311 = vmatprep.mubr.msk.f32.mxu0 %vm4670_vm2, %v4669_v50  ;;  %v3937_v53 = vld [vmem:[%s4764_s30 + $0x6] ss:$0 sm:$0xff] }
 0x316   : > { %4319 = vmatprep.subr.mxu0 %v4669_v50  ;;  %4542 = vmatprep.subr.bf16.mxu1 %v4541_v44 }
 0x317   : > { %4544 = vmatpush3.bf16.msra.mxu1 %v4541_v44 }
 0x318   : > { %4312 = vmatmul.mubr.msk.f32.vlgmr.msra.gmra.mrb[16].mxu0 %vm1543_vm3, %v830_v55  ;;  %4314 = vmatprep.subr.mxu1 %v4669_v50  ;;  %v4254_v55 = vpop.f32.mrb[6].mxu1 }
 0x319   : > { %4321 = vmatprep.mubr.msk.f32.mxu0 %vm4670_vm2, %v4669_v50  ;;  %4320 = vmatpush3.msra.mxu0 %v4983_v52  ;;  %v4988_v56 = vadd.f32 %v4254_v55, %v3937_v53  ;;  %v1181_v57 = vpop.f32.mrb[7].mxu1 }
 0x31a   : > { %4297 = vmatmul.mubr.msk.f32.vlgmr.msra.gmra.mrb[10].mxu1 %vm486_vm1, %v4802_v16  ;;  %4329 = vmatprep.subr.mxu0 %v4669_v50  ;;  %v4276_v60 = vpop.f32.mrb[8].mxu1  ;;  %v1182_v24 = vadd.f32 %v3937_v53, %v1181_v57 }
 0x31b   : > { %4316 = vmatprep.mubr.msk.f32.mxu1 %vm4670_vm2, %v4669_v50  ;;  %4315 = vmatpush3.msra.mxu1 %v1006_v51  ;;  %v4991_v61 = vadd.f32 %v4276_v60, %v3953_v59  ;;  %v1357_v62 = vpop.f32.mrb[9].mxu1 }
 0x31c   : > { %4324 = vmatprep.subr.mxu1 %v4669_v50  ;;  %v1358_v44 = vadd.f32 %v3953_v59, %v1357_v62 }
 0x3e7   : > { %v4948_v0 = vpop.f32.mrb[14].mxu0 }
 0x3e8   : > { %v4308_v1 = vpop.f32.mrb[15].mxu0 }
 0x3eb   : > { %v1785_v2 = vpop.f32.mrb[16].mxu0 }
 0x3ec   : > { %v1789_v3 = vmul.f32 0.35355338, %v1785_v2  ;;  %v4313_v5 = vpop.f32.mrb[17].mxu0 }
 0x3ed   : > { %v4994_v5 = vld [vmem:[%s4749_s21] sm:$0xff]  ;;  %v4298_v18 = vpop.f32.mrb[10].mxu1 }
 0x3ee   : > { %v1790_v7 = vadd.f32 %v1789_v3, %v4924_v34  ;;  %v1533_v23 = vpop.f32.mrb[11].mxu1 }
 0x3f0   : > { %v1791_v11 = vsel %vm1543_vm3, %v1790_v7, -inf }
 0x3f1   : > { %1792 = vmax.xlane.f32.xlu1 %v1791_v11  ;;  %v3969_v11 = vld [vmem:[%s4764_s30 + $0xb] ss:$0 sm:$0xff] }
 0x3f2   : > { %v5009_v21 = vadd.f32 %v4298_v18, %v3969_v11  ;;  %v1534_v45 = vadd.f32 %v3969_v11, %v1533_v23 }
 0x47e   : > { %v1793_v36 = vpop.xlane.xlu1 %1792 }
 0x47f   : > { %v1794_v37 = vsub.f32 %v1790_v7, %v1793_v36  ;;  %v1270_v7 = vadd.f32 %v4893_v10, %v4898_v14  ;;  %v1094_v10 = vadd.f32 %v4885_v6, %v4890_v9 }
 0x481   : > { %v1795_v38 = vmul.f32 1.442695, %v1794_v37 }
 0x483   : > { %4595 = vpow2.f32 %v1795_v38 }
 0x48d   : > { %v4596_v39 = vpop.eup %4595 }
 0x48e   : > { %v1797_v40 = vsel %vm1543_vm3, %v4596_v39, 0.0 }
 0x48f   : > { %1798 = vadd.xlane.f32.xlu1 %v1797_v40 }
 0x51c   : > { %v1799_v1 = vpop.xlane.xlu1 %1798 }
 0x51d   : > { %4597 = vrcp.f32 %v1799_v1 }
 0x527   : > { %v4598_v2 = vpop.eup %4597 }
 0x528   : > { %v1801_v3 = vmul.f32 %v4598_v2, %v4596_v39  ;;  %v5047_v2 = vld [vmem:[%s4749_s21 + $0x18] sm:$0xff] }
 0x52a   : > { %4317 = vmatmul.mubr.msk.f32.vlgmr.msra.gmra.mrb[12].mxu1 %vm1543_vm3, %v1801_v3 }
 0x52b   : > { %4325 = vmatpush3.msra.mxu1 %v4994_v5  ;;  %4326 = vmatprep.mubr.msk.f32.mxu1 %vm4670_vm2, %v4669_v50 }
 0x52c   : > { %4334 = vmatprep.subr.mxu1 %v4669_v50 }
 0x52e   : > { %4327 = vmatmul.mubr.msk.f32.vlgmr.msra.gmra.mrb[14].mxu1 %vm1543_vm3, %v4948_v0 }
 0x52f   : > { %4335 = vmatpush3.msra.mxu1 %v1270_v7  ;;  %4336 = vmatprep.mubr.msk.f32.mxu1 %vm4670_vm2, %v4669_v50 }
 0x530   : > { %4344 = vmatprep.subr.mxu1 %v4669_v50 }
 0x5fd   : > { %v1871_v25 = vpop.f32.mrb[12].mxu1 }
 0x5fe   : > { %v4318_v26 = vpop.f32.mrb[13].mxu1  ;;  %4322 = vmatmul.mubr.msk.f32.vlgmr.msra.gmra.mrb[18].mxu0 %vm1543_vm3, %v1871_v25 }
 0x5ff   : > { %4330 = vmatpush3.xpose.msk.msra.mxu0 %vm1543_vm3, %v1182_v24  ;;  %4331 = vmatprep.mubr.msk.f32.mxu0 %vm4670_vm2, %v4669_v50 }
 0x600   : > { %4339 = vmatprep.subr.mxu0 %v4669_v50 }
 0x601   : > { %v2019_v14 = vpop.f32.mrb[14].mxu1 }
 0x602   : > { %v4328_v0 = vpop.f32.mrb[15].mxu1  ;;  %4332 = vmatmul.mubr.msk.f32.vlgmr.msra.gmra.mrb[20].mxu0 %vm1543_vm3, %v1094_v10 }
 0x603   : > { %4341 = vmatprep.mubr.msk.f32.mxu0 %vm4670_vm2, %v4669_v50  ;;  %4340 = vmatpush3.msra.mxu0 %v5025_v17 }
 0x604   : > { %4349 = vmatprep.subr.mxu0 %v4669_v50 }
 0x6d1   : > { %v1946_v27 = vpop.f32.mrb[18].mxu0 }
 0x6d2   : > { %v2020_v28 = vadd.f32 %v2019_v14, %v1946_v27  ;;  %v4323_v29 = vpop.f32.mrb[19].mxu0 }
 0x6d5   : > { %v2095_v30 = vpop.f32.mrb[20].mxu0 }
 0x6d6   : > { %v2099_v32 = vmul.f32 0.35355338, %v2095_v30  ;;  %v4333_v35 = vpop.f32.mrb[21].mxu0 }
 0x6d8   : > { %v2100_v36 = vadd.f32 %v2099_v32, %v4924_v34 }
 0x6da   : > { %v2101_v6 = vsel %vm1543_vm3, %v2100_v36, -inf }
 0x6db   : > { %2102 = vmax.xlane.f32.xlu0 %v2101_v6 }
 0x768   : > { %v2103_v9 = vpop.xlane.xlu0 %2102 }
 0x769   : > { %v2104_v37 = vsub.f32 %v2100_v36, %v2103_v9 }
 0x76b   : > { %v2105_v38 = vmul.f32 1.442695, %v2104_v37 }
 0x76d   : > { %4599 = vpow2.f32 %v2105_v38 }
 0x777   : > { %v4600_v39 = vpop.eup %4599 }
 0x778   : > { %v2107_v40 = vsel %vm1543_vm3, %v4600_v39, 0.0 }
 0x779   : > { %2108 = vadd.xlane.f32.xlu1 %v2107_v40 }
 0x806   : > { %v2109_v41 = vpop.xlane.xlu1 %2108 }
 0x807   : > { %4601 = vrcp.f32 %v2109_v41 }
 0x811   : > { %v4602_v42 = vpop.eup %4601 }
 0x812   : > { %v2111_v43 = vmul.f32 %v4602_v42, %v4600_v39 }
 0x814   : > { %4337 = vmatmul.mubr.msk.f32.vlgmr.msra.gmra.mrb[16].mxu1 %vm1543_vm3, %v2111_v43 }
 0x815   : > { %4345 = vmatpush3.xpose.msk.msra.mxu1 %vm1543_vm3, %v1446_v22  ;;  %4346 = vmatprep.mubr.msk.f32.mxu1 %vm4670_vm2, %v4669_v50 }
 0x816   : > { %4354 = vmatprep.subr.mxu1 %v4669_v50 }
 0x818   : > { %4347 = vmatmul.mubr.msk.f32.vlgmr.msra.gmra.mrb[18].mxu1 %vm1543_vm3, %v1358_v44 }
 0x819   : > { %4356 = vmatprep.mubr.msk.f32.mxu1 %vm4670_vm2, %v4669_v50  ;;  %4355 = vmatpush3.msra.mxu1 %v5047_v2 }
 0x81a   : > { %4364 = vmatprep.subr.mxu1 %v4669_v50 }
 0x8e7   : > { %v2181_v46 = vpop.f32.mrb[16].mxu1 }
 0x8e8   : > { %v4338_v48 = vpop.f32.mrb[17].mxu1  ;;  %4342 = vmatmul.mubr.msk.f32.vlgmr.msra.gmra.mrb[22].mxu0 %vm1543_vm3, %v2181_v46 }
 0x8e9   : > { %4350 = vmatpush3.msra.mxu0 %v1534_v45  ;;  %4351 = vmatprep.mubr.msk.f32.mxu0 %vm4670_vm2, %v4669_v50 }
 0x8ea   : > { %4359 = vmatprep.subr.mxu0 %v4669_v50 }
 0x8eb   : > { %v2333_v15 = vpop.f32.mrb[18].mxu1 }
 0x8ec   : > { %v2337_v20 = vmul.f32 0.35355338, %v2333_v15  ;;  %v4348_v51 = vpop.f32.mrb[19].mxu1 }
 0x8ee   : > { %v2338_v53 = vadd.f32 %v2337_v20, %v4924_v34 }
 0x8f0   : > { %v2339_v55 = vsel %vm1543_vm3, %v2338_v53, -inf }
 0x8f1   : > { %2340 = vmax.xlane.f32.xlu0 %v2339_v55 }
 0x97e   : > { %v2341_v57 = vpop.xlane.xlu0 %2340 }
 0x97f   : > { %v2342_v59 = vsub.f32 %v2338_v53, %v2341_v57 }
 0x981   : > { %v2343_v60 = vmul.f32 1.442695, %v2342_v59 }
 0x983   : > { %4603 = vpow2.f32 %v2343_v60 }
 0x98d   : > { %v4604_v62 = vpop.eup %4603 }
 0x98e   : > { %v2345_v1 = vsel %vm1543_vm3, %v4604_v62, 0.0 }
 0x98f   : > { %2346 = vadd.xlane.f32.xlu1 %v2345_v1 }
 0x9bb   : > { %v2256_v3 = vpop.f32.mrb[22].mxu0 }
 0x9bc   : > { %v2260_v7 = vadd.f32 %v2256_v3, %v2020_v28  ;;  %v4343_v34 = vpop.f32.mrb[23].mxu0 }
 0xa1c   : > { %v2347_v11 = vpop.xlane.xlu1 %2346 }
 0xa1d   : > { %4605 = vrcp.f32 %v2347_v11 }
 0xa27   : > { %v4606_v18 = vpop.eup %4605 }
 0xa28   : > { %v2349_v23 = vmul.f32 %v4606_v18, %v4604_v62 }
 0xa2a   : > { %4352 = vmatmul.mubr.msk.f32.vlgmr.msra.gmra.mrb[24].mxu0 %vm1543_vm3, %v2349_v23 }
 0xa2b   : > { %4360 = vmatpush3.xpose.msk.msra.mxu0 %vm1543_vm3, %v4868_v54  ;;  %4361 = vmatprep.mubr.msk.f32.mxu0 %vm4670_vm2, %v4669_v50  ;;  %v468_v54 = vld [vmem:[%s5213_s2 + $0x1] sm:$0x1] }
 0xa2c   : > { %4369 = vmatprep.subr.mxu0 %v4669_v50 }
 0xa2e   : > { %4362 = vmatmul.mubr.msk.f32.vlgmr.msra.gmra.mrb[26].mxu0 %vm1543_vm3, %v4870_v58  ;;  %v470_v58 = vsub.f32 1.0, %v468_v54 }
 0xa2f   : > { %4370 = vmatpush3.xpose.msk.msra.mxu0 %vm1543_vm3, %v4882_v4  ;;  %4371 = vmatprep.mubr.msk.f32.mxu0 %vm4670_vm2, %v4669_v50 }
 0xa30   : > { %4379 = vmatprep.subr.mxu0 %v4669_v50  ;;  %v472_v4 = vmul.f32 -1e+09, %v470_v58 }
 0xa32   : > { %4372 = vmatmul.mubr.msk.f32.vlgmr.msra.gmra.mrb[28].mxu0 %vm1543_vm3, %v4930_v47  ;;  %v5079_v47 = vrot.slane %v472_v4, %v1624_v33  ;;  %v3991_v4 = vld [vmem:[%s4780_s17] ss:$0 sm:$0xff] }
 0xa33   : > { %4380 = vmatpush3.msra.mxu0 %v4983_v52  ;;  %4381 = vmatprep.mubr.msk.f32.mxu0 %vm4670_vm2, %v4669_v50 }
 0xa34   : > { %4389 = vmatprep.subr.mxu0 %v4669_v50 }
 0xafd   : > { %v2419_v24 = vpop.f32.mrb[24].mxu0 }
 0xafe   : > { %v4353_v25 = vpop.f32.mrb[25].mxu0  ;;  %4357 = vmatmul.mubr.msk.f32.vlgmr.msra.gmra.mrb[20].mxu1 %vm1543_vm3, %v2419_v24 }
 0xaff   : > { %4365 = vmatpush3.msra.mxu1 %v4878_v63  ;;  %4366 = vmatprep.mubr.msk.f32.mxu1 %vm4670_vm2, %v4669_v50 }
 0xb00   : > { %4374 = vmatprep.subr.mxu1 %v4669_v50 }
 0xb01   : > { %v2578_v52 = vpop.f32.mrb[26].mxu0 }
 0xb02   : > { %v2582_v26 = vmul.f32 0.35355338, %v2578_v52  ;;  %v4363_v10 = vpop.f32.mrb[27].mxu0 }
 0xb04   : > { %v2589_v14 = vadd.f32 %v5079_v47, %v2582_v26 }
 0xb05   : > { %v2746_v0 = vpop.f32.mrb[28].mxu0 }
 0xb06   : > { %v2750_v27 = vmul.f32 0.35355338, %v2746_v0  ;;  %v4373_v28 = vpop.f32.mrb[29].mxu0  ;;  %v2590_v29 = vsel %vm1543_vm3, %v2589_v14, -inf }
 0xb07   : > { %2591 = vmax.xlane.f32.xlu0 %v2590_v29 }
 0xb08   : > { %v2751_v63 = vadd.f32 %v2750_v27, %v5079_v47 }
 0xb0a   : > { %v2752_v30 = vsel %vm1543_vm3, %v2751_v63, -inf }
 0xb0b   : > { %2753 = vmax.xlane.f32.xlu1 %v2752_v30 }
 0xb94   : > { %v2592_v31 = vpop.xlane.xlu0 %2591 }
 0xb95   : > { %v2593_v33 = vsub.f32 %v2589_v14, %v2592_v31 }
 0xb97   : > { %v2594_v32 = vmul.f32 1.442695, %v2593_v33 }
 0xb98   : > { %v2754_v35 = vpop.xlane.xlu1 %2753 }
 0xb99   : > { %4607 = vpow2.f32 %v2594_v32  ;;  %v2755_v36 = vsub.f32 %v2751_v63, %v2754_v35 }
 0xb9b   : > { %v2756_v6 = vmul.f32 1.442695, %v2755_v36 }
 0xb9d   : > { %4609 = vpow2.f32 %v2756_v6 }
 0xba3   : > { %v4608_v9 = vpop.eup %4607 }
 0xba4   : > { %v2596_v37 = vsel %vm1543_vm3, %v4608_v9, 0.0 }
 0xba5   : > { %2597 = vadd.xlane.f32.xlu0 %v2596_v37  ;;  %v4010_v37 = vld [vmem:[%s4780_s17 + $0x1] ss:$0 sm:$0xff] }
 0xba7   : > { %v4610_v38 = vpop.eup %4609 }
 0xba8   : > { %v2758_v39 = vsel %vm1543_vm3, %v4610_v38, 0.0 }
 0xba9   : > { %2759 = vadd.xlane.f32.xlu1 %v2758_v39 }
 0xbd1   : > { %v2494_v40 = vpop.f32.mrb[20].mxu1 }
 0xbd2   : > { %v5088_v41 = vadd.f32 %v2494_v40, %v2260_v7  ;;  %v4358_v42 = vpop.f32.mrb[21].mxu1 }
 0xbd4   : > { %v2505_v24 = vadd.f32 %v3991_v4, %v5088_v41  ;;  %v4011_v41 = vld [vmem:[%s4780_s17 + $0x2] ss:$0 sm:$0xff] }
 0xbd6   : > { %v3459_v26 = vadd.f32 %v2505_v24, %v4797_v13 }
 0xbd8   : > { %v3461_v10 = vsel %vm486_vm1, %v3459_v26, 0.0 }
 0xc32   : > { %v2598_v43 = vpop.xlane.xlu0 %2597 }
 0xc33   : > { %4611 = vrcp.f32 %v2598_v43 }
 0xc36   : > { %v2760_v22 = vpop.xlane.xlu1 %2759 }
 0xc37   : > { %4613 = vrcp.f32 %v2760_v22 }
 0xc3d   : > { %v4612_v44 = vpop.eup %4611 }
 0xc3e   : > { %v2600_v45 = vmul.f32 %v4612_v44, %v4608_v9 }
 0xc40   : > { %4367 = vmatmul.mubr.msk.f32.vlgmr.msra.gmra.mrb[22].mxu1 %vm1543_vm3, %v2600_v45 }
 0xc41   : > { %v4614_v46 = vpop.eup %4613  ;;  %4375 = vmatpush3.msra.mxu1 %v4977_v49  ;;  %4376 = vmatprep.mubr.msk.f32.mxu1 %vm4670_vm2, %v4669_v50 }
 0xc42   : > { %v2762_v48 = vmul.f32 %v4614_v46, %v4610_v38  ;;  %4384 = vmatprep.subr.mxu1 %v4669_v50 }
 0xc44   : > { %4377 = vmatmul.mubr.msk.f32.vlgmr.msra.gmra.mrb[24].mxu1 %vm1543_vm3, %v2762_v48 }
 0xc45   : > { %4385 = vmatpush3.msra.mxu1 %v4994_v5  ;;  %4386 = vmatprep.mubr.msk.f32.mxu1 %vm4670_vm2, %v4669_v50 }
 0xc46   : > { %4394 = vmatprep.subr.mxu1 %v4669_v50 }
 0xd13   : > { %v2670_v15 = vpop.f32.mrb[22].mxu1 }
 0xd14   : > { %v4368_v20 = vpop.f32.mrb[23].mxu1  ;;  %4387 = vmatmul.mubr.msk.f32.vlgmr.msra.gmra.mrb[26].mxu1 %vm1543_vm3, %v2670_v15 }
 0xd15   : > { %4395 = vmatpush3.msra.mxu1 %v4896_v12  ;;  %4396 = vmatprep.mubr.msk.f32.mxu1 %vm4670_vm2, %v4669_v50 }
 0xd16   : > { %4404 = vmatprep.subr.mxu1 %v4669_v50 }
 0xd17   : > { %v2832_v49 = vpop.f32.mrb[24].mxu1 }
 0xd18   : > { %v4378_v51 = vpop.f32.mrb[25].mxu1  ;;  %4382 = vmatmul.mubr.msk.f32.vlgmr.msra.gmra.mrb[30].mxu0 %vm1543_vm3, %v2832_v49 }
 0xd19   : > { %4390 = vmatpush3.xpose.msk.msra.mxu0 %vm1543_vm3, %v4988_v56  ;;  %4391 = vmatprep.mubr.msk.f32.mxu0 %vm4670_vm2, %v4669_v50 }
 0xd1a   : > { %4399 = vmatprep.subr.mxu0 %v4669_v50 }
 0xd1c   : > { %4392 = vmatmul.mubr.msk.f32.vlgmr.msra.gmra.mrb[32].mxu0 %vm1543_vm3, %v4888_v8 }
 0xd1d   : > { %4400 = vmatpush3.msra.mxu0 %v5025_v17  ;;  %4401 = vmatprep.mubr.msk.f32.mxu0 %vm4670_vm2, %v4669_v50 }
 0xd1e   : > { %4409 = vmatprep.subr.mxu0 %v4669_v50 }
 0xde7   : > { %v2978_v12 = vpop.f32.mrb[26].mxu1 }
 0xde8   : > { %v4388_v5 = vpop.f32.mrb[27].mxu1 }
 0xdeb   : > { %v2905_v53 = vpop.f32.mrb[30].mxu0 }
 0xdec   : > { %v2979_v55 = vadd.f32 %v2978_v12, %v2905_v53  ;;  %v4383_v56 = vpop.f32.mrb[31].mxu0 }
 0xded   : > { %v3504_v56 = vld [vmem:[%s4759_s27] sm:$0xff] }
 0xdef   : > { %v3054_v57 = vpop.f32.mrb[32].mxu0 }
 0xdf0   : > { %v3058_v59 = vmul.f32 0.35355338, %v3054_v57  ;;  %v4393_v60 = vpop.f32.mrb[33].mxu0  ;;  %v3505_v57 = vld [vmem:[%s4759_s27 + $0x8] sm:$0xff] }
 0xdf1   : > { %v3507_v60 = vld [vmem:[%s4759_s27 + $0x18] sm:$0xff] }
 0xdf2   : > { %v3059_v62 = vadd.f32 %v3058_v59, %v5079_v47  ;;  %v4545_v59 = vpack.c.bf16 %v3505_v57, %v3504_v56 }
 0xdf4   : > { %v3060_v1 = vsel %vm1543_vm3, %v3059_v62, -inf }
 0xdf5   : > { %3061 = vmax.xlane.f32.xlu0 %v3060_v1  ;;  %v3598_v1 = vld [vmem:[%s4775_s16] sm:$0xff] }
 0xe82   : > { %v3062_v8 = vpop.xlane.xlu0 %3061 }
 0xe83   : > { %v3063_v17 = vsub.f32 %v3059_v62, %v3062_v8  ;;  %v3599_v8 = vld [vmem:[%s4775_s16 + $0x8] sm:$0xff] }
 0xe85   : > { %v3064_v3 = vmul.f32 1.442695, %v3063_v17  ;;  %v3600_v17 = vld [vmem:[%s4775_s16 + $0x10] sm:$0xff] }
 0xe87   : > { %4615 = vpow2.f32 %v3064_v3  ;;  %v4553_v3 = vpack.c.bf16 %v3599_v8, %v3598_v1 }
 0xe91   : > { %v4616_v7 = vpop.eup %4615 }
 0xe92   : > { %v3066_v34 = vsel %vm1543_vm3, %v4616_v7, 0.0 }
 0xe93   : > { %3067 = vadd.xlane.f32.xlu1 %v3066_v34 }
 0xf20   : > { %v3068_v11 = vpop.xlane.xlu1 %3067 }
 0xf21   : > { %4617 = vrcp.f32 %v3068_v11  ;;  %v3602_v11 = vld [vmem:[%s4775_s16 + $0x20] sm:$0xff] }
 0xf2b   : > { %v4618_v18 = vpop.eup %4617 }
 0xf2c   : > { %v3070_v23 = vmul.f32 %v4618_v18, %v4616_v7  ;;  %v3601_v7 = vld [vmem:[%s4775_s16 + $0x18] sm:$0xff]  ;;  %v3603_v18 = vld [vmem:[%s4775_s16 + $0x28] sm:$0xff] }
 0xf2d   : > { %v4557_v34 = vpack.c.bf16 %v3601_v7, %v3600_v17 }
 0xf2e   : > { %4397 = vmatmul.mubr.msk.f32.vlgmr.msra.gmra.mrb[28].mxu1 %vm1543_vm3, %v3070_v23  ;;  %v4561_v23 = vpack.c.bf16 %v3603_v18, %v3602_v11 }
 0xf2f   : > { %4405 = vmatpush3.xpose.msk.msra.mxu1 %vm1543_vm3, %v4904_v19  ;;  %4406 = vmatprep.mubr.msk.f32.mxu1 %vm4670_vm2, %v4669_v50 }
 0xf30   : > { %4414 = vmatprep.subr.mxu1 %v4669_v50 }
 0xf32   : > { %4407 = vmatmul.mubr.msk.f32.vlgmr.msra.gmra.mrb[30].mxu1 %vm1543_vm3, %v4991_v61 }
 0xf33   : > { %4415 = vmatpush3.msra.mxu1 %v5047_v2  ;;  %4416 = vmatprep.mubr.msk.f32.mxu1 %vm4670_vm2, %v4669_v50 }
 0xf34   : > { %4554 = vmatprep.subr.bf16.mxu1 %v4553_v3 }
0x1001   : > { %v3140_v54 = vpop.f32.mrb[28].mxu1 }
0x1002   : > { %v4398_v58 = vpop.f32.mrb[29].mxu1  ;;  %4402 = vmatmul.mubr.msk.f32.vlgmr.msra.gmra.mrb[34].mxu0 %vm1543_vm3, %v3140_v54 }
0x1003   : > { %4410 = vmatpush3.msra.mxu0 %v5009_v21  ;;  %4411 = vmatprep.mubr.msk.f32.mxu0 %vm4670_vm2, %v4669_v50 }
0x1004   : > { %4546 = vmatprep.subr.bf16.mxu0 %v4545_v59 }
0x1005   : > { %v3290_v19 = vpop.f32.mrb[30].mxu1 }
0x1006   : > { %v3294_v25 = vmul.f32 0.35355338, %v3290_v19  ;;  %v4408_v61 = vpop.f32.mrb[31].mxu1 }
0x1008   : > { %v3295_v2 = vadd.f32 %v3294_v25, %v5079_v47 }
0x100a   : > { %v3296_v52 = vsel %vm1543_vm3, %v3295_v2, -inf }
0x100b   : > { %3297 = vmax.xlane.f32.xlu0 %v3296_v52  ;;  %v3605_v52 = vld [vmem:[%s4775_s16 + $0x38] sm:$0xff] }
0x100f   : > { %3462 = vadd.xlane.f32.xlu0 %v3461_v10  ;;  %v4012_v10 = vld [vmem:[%s444_s19] ss:$0 sm:$0xff] }
0x1098   : > { %v3298_v14 = vpop.xlane.xlu0 %3297 }
0x1099   : > { %v3299_v21 = vsub.f32 %v3295_v2, %v3298_v14  ;;  %v3604_v2 = vld [vmem:[%s4775_s16 + $0x30] sm:$0xff] }
0x109b   : > { %v3300_v0 = vmul.f32 1.442695, %v3299_v21 }
0x109c   : > { %v3463_v27 = vpop.xlane.xlu0 %3462 }
0x109d   : > { %4619 = vpow2.f32 %v3300_v0  ;;  %v3468_v50 = vmul.f32 0.03125, %v3463_v27 }
0x109f   : > { %v3470_v28 = vsub.f32 %v3459_v26, %v3468_v50  ;;  %v4565_v26 = vpack.c.bf16 %v3605_v52, %v3604_v2 }
0x10a1   : > { %v3472_v29 = vmul.f32 %v3470_v28, %v3470_v28 }
0x10a3   : > { %v3474_v63 = vsel %vm486_vm1, %v3472_v29, 0.0  ;;  %v4016_v29 = vld [vmem:[%s4780_s17 + $0x3] ss:$0 sm:$0xff] }
0x10a4   : > { %3475 = vadd.xlane.f32.xlu0 %v3474_v63 }
0x10a7   : > { %v4620_v47 = vpop.eup %4619 }
0x10a8   : > { %v3302_v30 = vsel %vm1543_vm3, %v4620_v47, 0.0 }
0x10a9   : > { %3303 = vadd.xlane.f32.xlu1 %v3302_v30 }
0x10d5   : > { %v3213_v13 = vpop.f32.mrb[34].mxu0 }
0x10d6   : > { %v3217_v31 = vadd.f32 %v3213_v13, %v2979_v55  ;;  %v4403_v33 = vpop.f32.mrb[35].mxu0 }
0x1131   : > { %v3476_v32 = vpop.xlane.xlu0 %3475 }
0x1132   : > { %v3480_v35 = vmul.f32 0.03125, %v3476_v32 }
0x1134   : > { %v3482_v36 = vadd.f32 1e-05, %v3480_v35 }
0x1136   : > { %4621 = vrsqrt.f32 %v3482_v36  ;;  %v3304_v6 = vpop.xlane.xlu1 %3303 }
0x1137   : > { %4623 = vrcp.f32 %v3304_v6 }
0x1140   : > { %v4622_v9 = vpop.eup %4621 }
0x1141   : > { %v4624_v38 = vpop.eup %4623  ;;  %v3486_v39 = vmul.f32 %v4622_v9, %v3470_v28 }
0x1142   : > { %v3306_v40 = vmul.f32 %v4624_v38, %v4620_v47 }
0x1143   : > { %v3494_v42 = vmul.f32 %v4010_v37, %v3486_v39 }
0x1144   : > { %4412 = vmatmul.mubr.msk.f32.vlgmr.msra.gmra.mrb[36].mxu0 %vm1543_vm3, %v3306_v40 }
0x1145   : > { %v5146_v43 = vadd.f32 %v4011_v41, %v3494_v42  ;;  %4548 = vmatpush3.bf16.msra.mxu0 %v4545_v59 }
0x1147   : > { %4427 = vmatprep.mubr.msk.f32.mxu0 %vm486_vm1, %v5146_v43 }
0x1217   : > { %v3376_v22 = vpop.f32.mrb[36].mxu0 }
0x1218   : > { %v4413_v44 = vpop.f32.mrb[37].mxu0  ;;  %4417 = vmatmul.mubr.msk.f32.vlgmr.msra.gmra.mrb[32].mxu1 %vm1543_vm3, %v3376_v22 }
0x1219   : > { %4556 = vmatpush3.bf16.msra.mxu1 %v4553_v3 }
0x121a   : > { %4558 = vmatprep.subr.bf16.mxu1 %v4557_v34 }
0x121d   : > { %4560 = vmatpush3.bf16.msra.mxu1 %v4557_v34 }
0x121e   : > { %4562 = vmatprep.subr.bf16.mxu1 %v4561_v23 }
0x1221   : > { %4564 = vmatpush3.bf16.msra.mxu1 %v4561_v23 }
0x1222   : > { %4566 = vmatprep.subr.bf16.mxu1 %v4565_v26 }
0x1225   : > { %4568 = vmatpush3.bf16.msra.mxu1 %v4565_v26 }
0x12eb   : > { %v3449_v45 = vpop.f32.mrb[32].mxu1 }
0x12ec   : > { %v3453_v46 = vadd.f32 %v3449_v45, %v3217_v31  ;;  %v4418_v48 = vpop.f32.mrb[33].mxu1 }
0x12ee   : > { %v3454_v15 = vadd.f32 %v3991_v4, %v3453_v46 }
0x12f0   : > { %v3460_v20 = vadd.f32 %v3454_v15, %v4802_v16  ;;  %v3506_v16 = vld [vmem:[%s4759_s27 + $0x10] sm:$0xff] }
0x12f1   : > { %v4549_v62 = vpack.c.bf16 %v3507_v60, %v3506_v16 }
0x12f2   : > { %v3464_v49 = vsel %vm486_vm1, %v3460_v20, 0.0 }
0x12f3   : > { %3465 = vadd.xlane.f32.xlu1 %v3464_v49  ;;  %4550 = vmatprep.subr.bf16.mxu0 %v4549_v62  ;;  %v4021_v49 = vld [vmem:[%s4780_s17 + $0x4] ss:$0 sm:$0xff] }
0x12f4   : > { %4552 = vmatpush3.bf16.msra.mxu0 %v4549_v62 }
0x1380   : > { %v3466_v51 = vpop.xlane.xlu1 %3465 }
0x1381   : > { %v3469_v12 = vmul.f32 0.03125, %v3466_v51 }
0x1383   : > { %v3471_v5 = vsub.f32 %v3460_v20, %v3469_v12 }
0x1385   : > { %v3473_v53 = vmul.f32 %v3471_v5, %v3471_v5 }
0x1387   : > { %v3477_v55 = vsel %vm486_vm1, %v3473_v53, 0.0 }
0x1388   : > { %3478 = vadd.xlane.f32.xlu1 %v3477_v55 }
0x1415   : > { %v3479_v54 = vpop.xlane.xlu1 %3478 }
0x1416   : > { %v3481_v58 = vmul.f32 0.03125, %v3479_v54 }
0x1418   : > { %v3483_v4 = vadd.f32 1e-05, %v3481_v58 }
0x141a   : > { %4625 = vrsqrt.f32 %v3483_v4 }
0x1424   : > { %v4626_v19 = vpop.eup %4625 }
0x1425   : > { %v3487_v24 = vmul.f32 %v4626_v19, %v3471_v5  ;;  %v4022_v5 = vld [vmem:[%s4780_s17 + $0x5] ss:$0 sm:$0xff] }
0x1427   : > { %v3495_v25 = vmul.f32 %v4010_v37, %v3487_v24 }
0x1429   : > { %v3503_v61 = vadd.f32 %v4011_v41, %v3495_v25 }
0x142b   : > { %4428 = vmatmul.mubr.msk.f32.vlgmr.msra.gmra.mrb[38].mxu0 %vm486_vm1, %v3503_v61 }
0x14fe   : > { %v4429_v14 = vpop.f32.mrb[38].mxu0 }
0x14ff   : > { %v3593_v21 = vadd.f32 %v4429_v14, %v4012_v10  ;;  %v3587_v0 = vpop.f32.mrb[39].mxu0 }
0x1500   : > { %v3588_v27 = vadd.f32 %v4012_v10, %v3587_v0 }
0x1501   : > { %v3597_v28 = vmax.f32 %v3593_v21, 0.0 }
0x1502   : > { %v3596_v50 = vmax.f32 %v3588_v27, 0.0 }
0x1504   : > { %4446 = vmatprep.mubr.msk.f32.mxu1 %vm3614_vm4, %v3596_v50 }
0x1505   : > { %4447 = vmatmul.mubr.msk.f32.vlgmr.msra.gmra.mrb[34].mxu1 %vm3614_vm4, %v3597_v28 }
0x15d8   : > { %v4448_v63 = vpop.f32.mrb[34].mxu1 }
0x15d9   : > { %v3693_v47 = vadd.f32 %v4448_v63, %v4016_v29  ;;  %v3687_v30 = vpop.f32.mrb[35].mxu1 }
0x15da   : > { %v3688_v13 = vadd.f32 %v4016_v29, %v3687_v30 }
0x15db   : > { %v3701_v31 = vadd.f32 %v3693_v47, %v3503_v61 }
0x15dc   : > { %v3700_v33 = vadd.f32 %v3688_v13, %v5146_v43 }
0x15dd   : > { %v3705_v32 = vsel %vm486_vm1, %v3701_v31, 0.0 }
0x15de   : > { %3706 = vadd.xlane.f32.xlu1 %v3705_v32  ;;  %v3702_v35 = vsel %vm486_vm1, %v3700_v33, 0.0 }
0x15df   : > { %3703 = vadd.xlane.f32.xlu0 %v3702_v35 }
0x166b   : > { %v3707_v36 = vpop.xlane.xlu1 %3706 }
0x166c   : > { %v3709_v6 = vmul.f32 0.03125, %v3707_v36  ;;  %v3704_v9 = vpop.xlane.xlu0 %3703 }
0x166d   : > { %v3708_v37 = vmul.f32 0.03125, %v3704_v9 }
0x166e   : > { %v3711_v38 = vsub.f32 %v3701_v31, %v3709_v6 }
0x166f   : > { %v3710_v39 = vsub.f32 %v3700_v33, %v3708_v37 }
0x1670   : > { %v3713_v40 = vmul.f32 %v3711_v38, %v3711_v38 }
0x1671   : > { %v3712_v41 = vmul.f32 %v3710_v39, %v3710_v39 }
0x1672   : > { %v3717_v42 = vsel %vm486_vm1, %v3713_v40, 0.0 }
0x1673   : > { %3718 = vadd.xlane.f32.xlu1 %v3717_v42  ;;  %v3714_v43 = vsel %vm486_vm1, %v3712_v41, 0.0 }
0x1674   : > { %3715 = vadd.xlane.f32.xlu0 %v3714_v43 }
0x1700   : > { %v3719_v22 = vpop.xlane.xlu1 %3718 }
0x1701   : > { %v3721_v44 = vmul.f32 0.03125, %v3719_v22  ;;  %v3716_v45 = vpop.xlane.xlu0 %3715 }
0x1702   : > { %v3720_v46 = vmul.f32 0.03125, %v3716_v45 }
0x1703   : > { %v3723_v48 = vadd.f32 1e-05, %v3721_v44 }
0x1704   : > { %v3722_v15 = vadd.f32 1e-05, %v3720_v46 }
0x1705   : > { %4627 = vrsqrt.f32 %v3723_v48 }
0x1706   : > { %4629 = vrsqrt.f32 %v3722_v15 }
0x170f   : > { %v4628_v20 = vpop.eup %4627 }
0x1710   : > { %v4630_v51 = vpop.eup %4629  ;;  %v3727_v12 = vmul.f32 %v4628_v20, %v3711_v38 }
0x1711   : > { %v3726_v53 = vmul.f32 %v4630_v51, %v3710_v39  ;;  %3749 = sbr.rel (%p4023_p5) target bundleno = 5912 (0x1718), region = 68 }
0x1712   : > { %v3735_v55 = vmul.f32 %v4021_v49, %v3727_v12 }
0x1713   : > { %v3734_v56 = vmul.f32 %v4021_v49, %v3726_v53 }
0x1714   : > { %v3743_v57 = vadd.f32 %v4022_v5, %v3735_v55 }
0x1715   : > { %v3742_v59 = vadd.f32 %v4022_v5, %v3734_v56 }
0x1716   : > { %3745 = vst.msk [vmem:[#allocation2 + $0x8] sm:$0xff] %vm486_vm1, %v3743_v57  ;;  %3751 = vst.msk [vmem:[#allocation3 + $0x8] sm:$0xff] (!%p4023_p5), %vm486_vm1, %v3743_v57 }
0x1717   : > { %3744 = vst.msk [vmem:[#allocation2] sm:$0xff] %vm486_vm1, %v3742_v59  ;;  %3750 = vst.msk [vmem:[#allocation3] sm:$0xff] (!%p4023_p5), %vm486_vm1, %v3742_v59 }
0x1718 PF: > { %p4576_p6 = scmp.eq.s32.totalorder %s4735_s14, 1  ;;  %s4671_s15 = smov [#allocation3]  }
0x1719   : > { %s3758_s19 = sshll.u32 %s4671_s15, 4  ;;  %s3759_s19 = int_to_ptr.vmem [resolvable:$true] %s3758_s19 }
0x171a   : > { %s4631_s16 = scalar_lea.vmem %s3759_s19, 256  ;;  %p4638_p10 = scmp.lt.s32.totalorder %s3759_s19, %s3759_s19 }
0x171b   : > { %p4632_p7 = scmp.ne.s32.totalorder %s3759_s19, %s4631_s16  ;;  %p4639_p11 = scmp.lt.s32.totalorder %s4631_s16, %s4631_s16 }
0x171d   : > { %p4633_p8 = pnand %p4632_p7, %p4576_p6  ;;  %p4640_p12 = por %p4639_p11, %p4638_p10 }
0x171f   : > { %p4634_p9 = pneg %p4633_p8 }
0x1721   : > { %p4641_p13 = pnand %p4640_p12, %p4634_p9 }
0x1723   : > { %4644 = shalt.err (!%p4641_p13)
}
0x1724   : > { %s4645_s17 = scalar_lea.hbm %s5221_s10, 256 }
0x1725   : > { %p4646_p0 = scmp.ne.s32.totalorder %s5221_s10, %s4645_s17  ;;  %p4651_p3 = scmp.lt.u32.totalorder %s4645_s17, %s5221_s10 }
0x1727   : > { %p4647_p1 = pnand %p4646_p0, %p4576_p6 }
0x1729   : > { %p4648_p2 = pneg %p4647_p1 }
0x172b   : > { %p4653_p4 = pnand %p4651_p3, %p4648_p2 }
0x172d   : > { %4656 = shalt.err (!%p4653_p4)
}
0x172e   : > { %s4672_s5 = smov 128   ;;  %s4673_s13 = smov 8  }
0x172f   : > { %4573 = dma.vmem_to_hbm [thread:$0]  (%p4576_p6), %s3759_s19, 256, %s5221_s10, [#allocation4], %s4672_s5, %s4672_s5, %s4673_s13  }
0x1730   : > { %4662 = dma.done.wait (%p4576_p6), [#allocation4], 256  }
0x1731   : > { %4664 = vsyncadd (%p4576_p6), [#allocation4], 4294967040 }
0x1732 PF: > { %s5226_s20 = sld [smem:[#allocation6_spill]] }
0x1738   : > { %s21_s13 = sadd.s32 1, %s5226_s20  }
0x1739   : > { %p18_p5 = scmp.ge.s32.totalorder %s21_s13, 4  }
0x173b   :  { %20 = sbr.rel (!%p18_p5) target bundleno = 3 (0x3), region = 143 }
0x1742   :  { %3774 = vsyncpa [#allocation4], 1 }
0x1743   :  { %3776 = vsyncpa [#allocation4 + $0x1], 1 }

</bundles_post_ra>
